<compile_context>
chip_gen: v6e
topology: v6e:2x2x1
jax: 0.10.0
libtpu: 0.0.40
codegen_flags: <defaults>
</compile_context>

<pallas_src>
import functools

import jax
import jax.numpy as jnp
from jax import lax
from jax.experimental import pallas as pl
from jax.experimental.pallas import tpu as pltpu


def _lstm_block_kernel(minmax_ref, len_ref, h0_ref, c0_ref, x_ref, wih_ref,
                       whh_ref, b_ref, y_ref, hn_ref, cn_ref,
                       gx_scr, h_scr, c_scr, *, hidden_size, block_t):
    """One LSTM layer, one (batch-tile, time-block) grid step.

    State (h, c) lives in f32 VMEM scratch and persists across time blocks of a
    batch tile.  gx_scr holds the block's fused input projection.
    """
    H = hidden_size
    blk = pl.program_id(1)                      # time-block index (sequential)
    t0 = blk * block_t
    min_len = minmax_ref[0]
    max_len = minmax_ref[1]

    @pl.when(blk == 0)
    def _init():
        h_scr[...] = h0_ref[...].astype(jnp.float32)
        c_scr[...] = c0_ref[...].astype(jnp.float32)

    # Hoisted int32 broadcast of the per-row lengths (masked path only).
    len_b = jnp.broadcast_to(len_ref[...], h_scr.shape)          # (block_b, H)

    def run_block(masked):
        # Block-level fused input projection: block_t small MXU matmuls with
        # static indices.  They do not depend on the recurrent state, and the
        # recurrence itself is EUP/VALU bound, so these pushes are cheap filler.
        for tt in range(block_t):
            gx_scr[tt] = (jnp.dot(x_ref[tt].astype(jnp.bfloat16), wih_ref[...],
                                  preferred_element_type=jnp.float32)
                          + b_ref[...])

        def step(tt, carry):
            h_prev, c_prev = carry
            gates = gx_scr[tt] + jnp.dot(h_prev.astype(jnp.bfloat16),
                                         whh_ref[...],
                                         preferred_element_type=jnp.float32)
            # Gate columns were permuted to [i, f, o, g]: one tanh-based sigmoid
            # over a contiguous (B, 3H) slab + one tanh over (B, H).
            ifo = 0.5 * jnp.tanh(0.5 * gates[:, :3 * H]) + 0.5
            g_g = jnp.tanh(gates[:, 3 * H:])
            i_g = ifo[:, 0 * H:1 * H]
            f_g = ifo[:, 1 * H:2 * H]
            o_g = ifo[:, 2 * H:3 * H]
            c_new = f_g * c_prev + i_g * g_g
            h_new = o_g * jnp.tanh(c_new)
            if masked:
                valid = len_b > (t0 + tt)
                h_new = jnp.where(valid, h_new, h_prev)
                c_new = jnp.where(valid, c_new, c_prev)
            y_ref[tt] = h_new.astype(y_ref.dtype)
            return h_new, c_new

        h_fin, c_fin = lax.fori_loop(0, block_t, step,
                                     (h_scr[...], c_scr[...]),
                                     unroll=min(8, block_t))
        h_scr[...] = h_fin
        c_scr[...] = c_fin

    # Block-level specialization from the scalar-prefetched [min, max] lengths.
    full_valid = (t0 + block_t) <= min_len     # no row needs masking
    tail_hold = t0 >= max_len                  # every row past its length

    @pl.when(tail_hold)
    def _hold():
        held = h_scr[...].astype(y_ref.dtype)
        y_ref[...] = jnp.broadcast_to(held[None], y_ref.shape)

    @pl.when(full_valid)
    def _dense():
        run_block(masked=False)

    @pl.when(jnp.logical_and(jnp.logical_not(full_valid),
                             jnp.logical_not(tail_hold)))
    def _ragged():
        run_block(masked=True)

    # Constant-index output blocks stay VMEM-resident: write only on the last
    # time block of this batch tile.
    @pl.when(blk == pl.num_programs(1) - 1)
    def _fin():
        hn_ref[...] = h_scr[...].astype(hn_ref.dtype)
        cn_ref[...] = c_scr[...].astype(cn_ref.dtype)


def _reorder_gate_columns(w, H):
    """Permute gate columns [i, f, g, o] -> [i, f, o, g] along the last axis."""
    return jnp.concatenate([w[..., :2 * H], w[..., 3 * H:4 * H],
                            w[..., 2 * H:3 * H]], axis=-1)


def _single_buffered_spec(shape, index_map):
    """BlockSpec for operands whose block never changes: one VMEM buffer."""
    try:
        return pl.BlockSpec(shape, index_map, pipeline_mode=pl.Buffered(1))
    except Exception:   # older jax without pipeline_mode / Buffered(1)
        return pl.BlockSpec(shape, index_map)


def _vmem_budget_bytes():
    """~75% of this generation's physical VMEM (64 MiB v7x, 128 MiB v5e/v6e)."""
    cap = 64 * 1024 * 1024
    try:
        cap = int(getattr(pltpu.get_tpu_info(), "vmem_capacity_bytes", cap))
    except Exception:
        pass
    return int(cap * 3 // 4)


def _auto_block_t(budget, B, D, H, x_bytes, y_bytes, T):
    """Pick block_t from the VMEM budget (resident weights + streamed slabs)."""
    resident = (2 * (D * 4 * H + H * 4 * H) * 2   # bf16 W_ih + W_hh (x2 margin)
                + 2 * 4 * H * 4                   # bias
                + 6 * B * H * 4                   # h0/c0/hn/cn + h/c scratch
                + 2 * B * 4 + 1024)               # lengths, minmax, slack
    per_t = (2 * B * D * x_bytes                  # x slab, double buffered
             + 2 * B * H * y_bytes                # y slab, double buffered
             + B * 4 * H * 4)                     # gates_x scratch (f32)
    bt = (budget - resident) // max(per_t, 1)
    return int(max(1, min(bt, 32, T)))


def lstm_layer_pallas(x, length, h0, c0, w_ih, w_hh, b, *,
                      out_dtype=None, block_t=None, block_b=None):
    """One LSTM layer.  x: (T, B, D_in), length: (B,), h0/c0: (B, H),
    w_ih: (D_in, 4H), w_hh: (H, 4H), b: (1, 4H).  Returns (y, h_n, c_n)."""
    T, B, D = x.shape
    H = h0.shape[1]
    out_dtype = x.dtype if out_dtype is None else out_dtype

    budget = _vmem_budget_bytes()
    if block_t is None:
        block_t = _auto_block_t(budget, B, D, H,
                                jnp.dtype(x.dtype).itemsize,
                                jnp.dtype(out_dtype).itemsize, T)
    block_t = max(1, min(int(block_t), T))

    if block_b is None:
        block_b = B
    assert B % block_b == 0 and (block_b == B or block_b % 8 == 0), (
        "block_b must divide B and be a multiple of 8 (or the full batch)")
    n_b = B // block_b

    n_blk = pl.cdiv(T, block_t)
    T_pad = n_blk * block_t
    if T_pad != T:
        x = jnp.pad(x, ((0, T_pad - T), (0, 0), (0, 0)))

    # One-time weight prep: permute gate columns and make MXU operands bf16.
    w_ih_b = _reorder_gate_columns(w_ih, H).astype(jnp.bfloat16)
    w_hh_b = _reorder_gate_columns(w_hh, H).astype(jnp.bfloat16)
    b_r = _reorder_gate_columns(b, H).astype(jnp.float32)

    len_i = length.astype(jnp.int32).reshape(B, 1)
    minmax = jnp.stack([jnp.min(len_i), jnp.max(len_i)]).astype(jnp.int32)
    h0f = h0.astype(jnp.float32)
    c0f = c0.astype(jnp.float32)

    kernel = functools.partial(_lstm_block_kernel, hidden_size=H,
                               block_t=block_t)
    out_shapes = (
        jax.ShapeDtypeStruct((T_pad, B, H), out_dtype),   # per-step hidden
        jax.ShapeDtypeStruct((B, H), jnp.float32),        # final h
        jax.ShapeDtypeStruct((B, H), jnp.float32),        # final c
    )
    grid_spec = pltpu.PrefetchScalarGridSpec(
        num_scalar_prefetch=1,
        grid=(n_b, n_blk),
        in_specs=[
            pl.BlockSpec((block_b, 1), lambda bb, tb, mm: (bb, 0)),         # len
            pl.BlockSpec((block_b, H), lambda bb, tb, mm: (bb, 0)),         # h0
            pl.BlockSpec((block_b, H), lambda bb, tb, mm: (bb, 0)),         # c0
            pl.BlockSpec((block_t, block_b, D),
                         lambda bb, tb, mm: (tb, bb, 0)),                   # x slab
            _single_buffered_spec((D, 4 * H), lambda bb, tb, mm: (0, 0)),   # W_ih
            _single_buffered_spec((H, 4 * H), lambda bb, tb, mm: (0, 0)),   # W_hh
            _single_buffered_spec((1, 4 * H), lambda bb, tb, mm: (0, 0)),   # bias
        ],
        out_specs=[
            pl.BlockSpec((block_t, block_b, H), lambda bb, tb, mm: (tb, bb, 0)),
            pl.BlockSpec((block_b, H), lambda bb, tb, mm: (bb, 0)),
            pl.BlockSpec((block_b, H), lambda bb, tb, mm: (bb, 0)),
        ],
        scratch_shapes=[
            pltpu.VMEM((block_t, block_b, 4 * H), jnp.float32),  # gates_x block
            pltpu.VMEM((block_b, H), jnp.float32),               # h state
            pltpu.VMEM((block_b, H), jnp.float32),               # c state
        ],
    )
    y_pad, h_n, c_n = pl.pallas_call(
        kernel,
        out_shape=out_shapes,
        grid_spec=grid_spec,
        compiler_params=pltpu.CompilerParams(
            dimension_semantics=("parallel", "arbitrary"),
            vmem_limit_bytes=budget),
    )(minmax, len_i, h0f, c0f, x, w_ih_b, w_hh_b, b_r)
    return y_pad[:T], h_n, c_n


def init_lstm_params(key, input_size, hidden_size, num_layers):
    """Uniform(-1/sqrt(H), 1/sqrt(H)) init; bias stands in for b_ih + b_hh."""
    bound = 1.0 / jnp.sqrt(jnp.float32(hidden_size))
    params = []
    for layer in range(num_layers):
        d_in = input_size if layer == 0 else hidden_size
        key, k1, k2, k3 = jax.random.split(key, 4)
        w_ih = jax.random.uniform(k1, (d_in, 4 * hidden_size), jnp.float32,
                                  -bound, bound)
        w_hh = jax.random.uniform(k2, (hidden_size, 4 * hidden_size), jnp.float32,
                                  -bound, bound)
        b = jax.random.uniform(k3, (1, 4 * hidden_size), jnp.float32,
                               -2 * bound, 2 * bound)
        params.append((w_ih, w_hh, b))
    return params


def lstm_forward(params, x, hx=None, length=None, batch_first=False,
                 dropout=0.0, block_t=None):
    """Mirrors LSTM.forward of the reference module: returns (output, (h_n, c_n)).

    As in the reference module: output stays time-major (only the input is
    transposed for batch_first) and each layer l > 0 starts from layer l-1's
    final (h, c) state.
    """
    if batch_first:
        x = jnp.transpose(x, (1, 0, 2))
    T, B, _ = x.shape
    H = params[0][1].shape[0]
    num_layers = len(params)
    if length is None:
        length = jnp.full((B,), T, dtype=jnp.int32)
    if hx is None:
        zeros = jnp.zeros((B, H), x.dtype)
        hx = (zeros, zeros)

    # TODO(synk): inter-layer dropout is identity (dropout=0 / eval mode).
    h_n, c_n = [], []
    layer_output = None
    inp = x
    for layer, (w_ih, w_hh, b) in enumerate(params):
        if layer == 0 and hx[0].ndim > 2:
            _hx = (hx[0][0], hx[1][0])      # matches hx[0][layer] with layer == 0
        else:
            _hx = hx
        # Intermediate layers stream bf16 activations; final layer emits x.dtype.
        out_dtype = x.dtype if layer == num_layers - 1 else jnp.bfloat16
        layer_output, layer_h_n, layer_c_n = lstm_layer_pallas(
            inp, length, _hx[0], _hx[1], w_ih, w_hh, b,
            out_dtype=out_dtype, block_t=block_t)
        inp = layer_output
        h_n.append(layer_h_n)
        c_n.append(layer_c_n)
        hx = (layer_h_n, layer_c_n)
    h_n = jnp.stack(h_n, 0).astype(x.dtype)
    c_n = jnp.stack(c_n, 0).astype(x.dtype)
    return layer_output, (h_n, c_n)


def _lstm_reference(params, x, length):
    """Pure-JAX reference mirroring the kernel's numerics (bf16 MXU operands,
    f32 accumulation/state), original [i,f,g,o] gate order, same layer chain."""
    T, B, _ = x.shape
    H = params[0][1].shape[0]
    h = jnp.zeros((B, H), jnp.float32)
    c = jnp.zeros((B, H), jnp.float32)
    h_n, c_n = [], []
    inp = x
    for (w_ih, w_hh, b) in params:
        w_ih_b = w_ih.astype(jnp.bfloat16)
        w_hh_b = w_hh.astype(jnp.bfloat16)
        outs = []
        for t in range(T):
            gates = (jnp.dot(inp[t].astype(jnp.bfloat16), w_ih_b,
                             preferred_element_type=jnp.float32) + b
                     + jnp.dot(h.astype(jnp.bfloat16), w_hh_b,
                               preferred_element_type=jnp.float32))
            i_g = jax.nn.sigmoid(gates[:, 0 * H:1 * H])
            f_g = jax.nn.sigmoid(gates[:, 1 * H:2 * H])
            g_g = jnp.tanh(gates[:, 2 * H:3 * H])
            o_g = jax.nn.sigmoid(gates[:, 3 * H:4 * H])
            c_new = f_g * c + i_g * g_g
            h_new = o_g * jnp.tanh(c_new)
            valid = (length > t)[:, None]
            h = jnp.where(valid, h_new, h)
            c = jnp.where(valid, c_new, c)
            outs.append(h)
        inp = jnp.stack(outs, 0)
        h_n.append(h)
        c_n.append(c)
    return inp, (jnp.stack(h_n, 0), jnp.stack(c_n, 0))


if __name__ == "__main__":
    key = jax.random.PRNGKey(0)
    # seq, batch, input_size, hidden_size, num_layers
    T, B, D, H, L = 10, 4, 16, 32, 2

    kp, kx = jax.random.split(key, 2)
    params = init_lstm_params(kp, D, H, L)
    x = jax.random.normal(kx, (T, B, D), jnp.float32)
    # Ragged lengths chosen so all three in-kernel block specializations run
    # with block_t=4: block 0 fully valid (min len 4), block 1 partially masked,
    # block 2 entirely past max(length)=8 (pure hold), plus the padded tail.
    length = jnp.array([8, 7, 4, 8], dtype=jnp.int32)

    out, (h_n, c_n) = lstm_forward(params, x, hx=None, length=length,
                                   batch_first=False, dropout=0.0, block_t=4)
    jax.block_until_ready((out, h_n, c_n))

    # Auto block_t / VMEM-budget path (single time block at these sizes).
    out2, (h_n2, c_n2) = lstm_forward(params, x, hx=None, length=length,
                                      batch_first=False, dropout=0.0,
                                      block_t=None)
    jax.block_until_ready((out2, h_n2, c_n2))

    ref_out, (ref_h, ref_c) = _lstm_reference(params, x, length)
    assert out.shape == (T, B, H)
    assert h_n.shape == (L, B, H) and c_n.shape == (L, B, H)
    for got, want in ((out, ref_out), (h_n, ref_h), (c_n, ref_c),
                      (out2, ref_out), (h_n2, ref_h), (c_n2, ref_c)):
        assert jnp.allclose(got, want, atol=1e-2, rtol=1e-2)

    print("KERNEL_OK")
</pallas_src>

<mosaic_0001>
module attributes {stable_mosaic.version = 11 : i64} {
  func.func @_lstm_block_kernel(%arg0: i32, %arg1: i32, %arg2: memref<2xi32, #tpu.memory_space<smem>>, %arg3: memref<4x1xi32, #tpu.memory_space<vmem>>, %arg4: memref<4x32xf32, #tpu.memory_space<vmem>>, %arg5: memref<4x32xf32, #tpu.memory_space<vmem>>, %arg6: memref<4x4x16xf32, #tpu.memory_space<vmem>>, %arg7: memref<16x128xbf16, #tpu.memory_space<vmem>>, %arg8: memref<32x128xbf16, #tpu.memory_space<vmem>>, %arg9: memref<1x128xf32, #tpu.memory_space<vmem>>, %arg10: memref<4x4x32xbf16, #tpu.memory_space<vmem>>, %arg11: memref<4x32xf32, #tpu.memory_space<vmem>>, %arg12: memref<4x32xf32, #tpu.memory_space<vmem>>, %arg13: memref<4x4x128xf32, #tpu.memory_space<vmem>>, %arg14: memref<4x32xf32, #tpu.memory_space<vmem>>, %arg15: memref<4x32xf32, #tpu.memory_space<vmem>>) attributes {dimension_semantics = [#tpu.dimension_semantics<parallel>, #tpu.dimension_semantics<arbitrary>], iteration_bounds = array<i64: 1, 3>, scalar_prefetch = 1 : i64, scratch_operands = 3 : i64, tpu.core_type = #tpu.core_type<tc>, window_params = [{transform_indices = @transform_0, window_bounds = array<i64: 4, 1>}, {transform_indices = @transform_1, window_bounds = array<i64: 4, 32>}, {transform_indices = @transform_2, window_bounds = array<i64: 4, 32>}, {transform_indices = @transform_3, window_bounds = array<i64: 4, 4, 16>}, {pipeline_mode = #tpu.pipeline_mode<synchronous>, transform_indices = @transform_4, window_bounds = array<i64: 16, 128>}, {pipeline_mode = #tpu.pipeline_mode<synchronous>, transform_indices = @transform_5, window_bounds = array<i64: 32, 128>}, {pipeline_mode = #tpu.pipeline_mode<synchronous>, transform_indices = @transform_6, window_bounds = array<i64: 1, 128>}, {transform_indices = @transform_7, window_bounds = array<i64: 4, 4, 32>}, {transform_indices = @transform_8, window_bounds = array<i64: 4, 32>}, {transform_indices = @transform_9, window_bounds = array<i64: 4, 32>}]} {
    %c4_i32 = arith.constant 4 : i32
    %0 = arith.muli %arg1, %c4_i32 : i32
    %c0 = arith.constant 0 : index
    %1 = memref.load %arg2[%c0] : memref<2xi32, #tpu.memory_space<smem>>
    %c1 = arith.constant 1 : index
    %2 = memref.load %arg2[%c1] : memref<2xi32, #tpu.memory_space<smem>>
    %c0_i32 = arith.constant 0 : i32
    %3 = arith.cmpi eq, %arg1, %c0_i32 : i32
    %4 = arith.extui %3 : i1 to i32
    %c0_i32_0 = arith.constant 0 : i32
    %5 = arith.cmpi ne, %4, %c0_i32_0 : i32
    scf.if %5 {
      %c0_9 = arith.constant 0 : index
      %c0_10 = arith.constant 0 : index
      %24 = vector.load %arg4[%c0_9, %c0_10] : memref<4x32xf32, #tpu.memory_space<vmem>>, vector<4x32xf32>
      %c0_11 = arith.constant 0 : index
      %c0_12 = arith.constant 0 : index
      %25 = vector.load %arg14[%c0_11, %c0_12] : memref<4x32xf32, #tpu.memory_space<vmem>>, vector<4x32xf32>
      tpu.vector_store %arg14[%c0_11, %c0_12], %24 {strides = array<i32>} : memref<4x32xf32, #tpu.memory_space<vmem>>, vector<4x32xf32>,
      %c0_13 = arith.constant 0 : index
      %c0_14 = arith.constant 0 : index
      %26 = vector.load %arg5[%c0_13, %c0_14] : memref<4x32xf32, #tpu.memory_space<vmem>>, vector<4x32xf32>
      %c0_15 = arith.constant 0 : index
      %c0_16 = arith.constant 0 : index
      %27 = vector.load %arg15[%c0_15, %c0_16] : memref<4x32xf32, #tpu.memory_space<vmem>>, vector<4x32xf32>
      tpu.vector_store %arg15[%c0_15, %c0_16], %26 {strides = array<i32>} : memref<4x32xf32, #tpu.memory_space<vmem>>, vector<4x32xf32>,
    } else {
    }
    %c0_1 = arith.constant 0 : index
    %c0_2 = arith.constant 0 : index
    %6 = vector.load %arg3[%c0_1, %c0_2] : memref<4x1xi32, #tpu.memory_space<vmem>>, vector<4x1xi32>
    %7 = vector.shape_cast %6 : vector<4x1xi32> to vector<4x1xi32>
    %8 = vector.broadcast %7 : vector<4x1xi32> to vector<4x32xi32>
    %c4_i32_3 = arith.constant 4 : i32
    %9 = arith.addi %0, %c4_i32_3 : i32
    %10 = arith.cmpi sle, %9, %1 : i32
    %11 = arith.cmpi sge, %0, %2 : i32
    %12 = arith.extui %11 : i1 to i32
    %c0_i32_4 = arith.constant 0 : i32
    %13 = arith.cmpi ne, %12, %c0_i32_4 : i32
    scf.if %13 {
      %c0_9 = arith.constant 0 : index
      %c0_10 = arith.constant 0 : index
      %24 = vector.load %arg14[%c0_9, %c0_10] : memref<4x32xf32, #tpu.memory_space<vmem>>, vector<4x32xf32>
      %25 = arith.truncf %24 : vector<4x32xf32> to vector<4x32xbf16>
      %26 = vector.shape_cast %25 : vector<4x32xbf16> to vector<1x4x32xbf16>
      %27 = vector.shape_cast %26 : vector<1x4x32xbf16> to vector<1x4x32xbf16>
      %28 = vector.broadcast %27 : vector<1x4x32xbf16> to vector<4x4x32xbf16>
      %c0_11 = arith.constant 0 : index
      %c0_12 = arith.constant 0 : index
      %c0_13 = arith.constant 0 : index
      %29 = vector.load %arg10[%c0_11, %c0_12, %c0_13] : memref<4x4x32xbf16, #tpu.memory_space<vmem>>, vector<4x4x32xbf16>
      tpu.vector_store %arg10[%c0_11, %c0_12, %c0_13], %28 {strides = array<i32>} : memref<4x4x32xbf16, #tpu.memory_space<vmem>>, vector<4x4x32xbf16>,
    } else {
    }
    %14 = arith.extui %10 : i1 to i32
    %c0_i32_5 = arith.constant 0 : i32
    %15 = arith.cmpi ne, %14, %c0_i32_5 : i32
    scf.if %15 {
      %c0_9 = arith.constant 0 : index
      %c0_10 = arith.constant 0 : index
      %c0_11 = arith.constant 0 : index
      %24 = vector.load %arg6[%c0_9, %c0_10, %c0_11] : memref<4x4x16xf32, #tpu.memory_space<vmem>>, vector<1x4x16xf32>
      %25 = vector.shape_cast %24 : vector<1x4x16xf32> to vector<4x16xf32>
      %26 = arith.truncf %25 : vector<4x16xf32> to vector<4x16xbf16>
      %c0_12 = arith.constant 0 : index
      %c0_13 = arith.constant 0 : index
      %27 = vector.load %arg7[%c0_12, %c0_13] : memref<16x128xbf16, #tpu.memory_space<vmem>>, vector<16x128xbf16>
      %cst = arith.constant dense<0.000000e+00> : vector<4x128xf32>
      %28 = tpu.matmul %26, %27, %cst {dimension_numbers = #tpu.dot_dimension_numbers<[1], [0], [0], [1], [0, 0, 1, 1], [], []>} : vector<4x16xbf16>, vector<16x128xbf16>, vector<4x128xf32> -> vector<4x128xf32>
      %c0_14 = arith.constant 0 : index
      %c0_15 = arith.constant 0 : index
      %29 = vector.load %arg9[%c0_14, %c0_15] : memref<1x128xf32, #tpu.memory_space<vmem>>, vector<1x128xf32>
      %30 = vector.broadcast %29 : vector<1x128xf32> to vector<4x128xf32>
      %31 = arith.addf %28, %30 : vector<4x128xf32>
      %c0_16 = arith.constant 0 : index
      %c0_17 = arith.constant 0 : index
      %c0_18 = arith.constant 0 : index
      %32 = vector.load %arg13[%c0_16, %c0_17, %c0_18] : memref<4x4x128xf32, #tpu.memory_space<vmem>>, vector<1x4x128xf32>
      %33 = vector.shape_cast %32 : vector<1x4x128xf32> to vector<4x128xf32>
      %34 = vector.shape_cast %31 : vector<4x128xf32> to vector<1x4x128xf32>
      tpu.vector_store %arg13[%c0_16, %c0_17, %c0_18], %34 {strides = array<i32>} : memref<4x4x128xf32, #tpu.memory_space<vmem>>, vector<1x4x128xf32>,
      %c1_19 = arith.constant 1 : index
      %c0_20 = arith.constant 0 : index
      %c0_21 = arith.constant 0 : index
      %35 = vector.load %arg6[%c1_19, %c0_20, %c0_21] : memref<4x4x16xf32, #tpu.memory_space<vmem>>, vector<1x4x16xf32>
      %36 = vector.shape_cast %35 : vector<1x4x16xf32> to vector<4x16xf32>
      %37 = arith.truncf %36 : vector<4x16xf32> to vector<4x16xbf16>
      %c0_22 = arith.constant 0 : index
      %c0_23 = arith.constant 0 : index
      %38 = vector.load %arg7[%c0_22, %c0_23] : memref<16x128xbf16, #tpu.memory_space<vmem>>, vector<16x128xbf16>
      %cst_24 = arith.constant dense<0.000000e+00> : vector<4x128xf32>
      %39 = tpu.matmul %37, %38, %cst_24 {dimension_numbers = #tpu.dot_dimension_numbers<[1], [0], [0], [1], [0, 0, 1, 1], [], []>} : vector<4x16xbf16>, vector<16x128xbf16>, vector<4x128xf32> -> vector<4x128xf32>
      %c0_25 = arith.constant 0 : index
      %c0_26 = arith.constant 0 : index
      %40 = vector.load %arg9[%c0_25, %c0_26] : memref<1x128xf32, #tpu.memory_space<vmem>>, vector<1x128xf32>
      %41 = vector.broadcast %40 : vector<1x128xf32> to vector<4x128xf32>
      %42 = arith.addf %39, %41 : vector<4x128xf32>
      %c1_27 = arith.constant 1 : index
      %c0_28 = arith.constant 0 : index
      %c0_29 = arith.constant 0 : index
      %43 = vector.load %arg13[%c1_27, %c0_28, %c0_29] : memref<4x4x128xf32, #tpu.memory_space<vmem>>, vector<1x4x128xf32>
      %44 = vector.shape_cast %43 : vector<1x4x128xf32> to vector<4x128xf32>
      %45 = vector.shape_cast %42 : vector<4x128xf32> to vector<1x4x128xf32>
      tpu.vector_store %arg13[%c1_27, %c0_28, %c0_29], %45 {strides = array<i32>} : memref<4x4x128xf32, #tpu.memory_space<vmem>>, vector<1x4x128xf32>,
      %c2 = arith.constant 2 : index
      %c0_30 = arith.constant 0 : index
      %c0_31 = arith.constant 0 : index
      %46 = vector.load %arg6[%c2, %c0_30, %c0_31] : memref<4x4x16xf32, #tpu.memory_space<vmem>>, vector<1x4x16xf32>
      %47 = vector.shape_cast %46 : vector<1x4x16xf32> to vector<4x16xf32>
      %48 = arith.truncf %47 : vector<4x16xf32> to vector<4x16xbf16>
      %c0_32 = arith.constant 0 : index
      %c0_33 = arith.constant 0 : index
      %49 = vector.load %arg7[%c0_32, %c0_33] : memref<16x128xbf16, #tpu.memory_space<vmem>>, vector<16x128xbf16>
      %cst_34 = arith.constant dense<0.000000e+00> : vector<4x128xf32>
      %50 = tpu.matmul %48, %49, %cst_34 {dimension_numbers = #tpu.dot_dimension_numbers<[1], [0], [0], [1], [0, 0, 1, 1], [], []>} : vector<4x16xbf16>, vector<16x128xbf16>, vector<4x128xf32> -> vector<4x128xf32>
      %c0_35 = arith.constant 0 : index
      %c0_36 = arith.constant 0 : index
      %51 = vector.load %arg9[%c0_35, %c0_36] : memref<1x128xf32, #tpu.memory_space<vmem>>, vector<1x128xf32>
      %52 = vector.broadcast %51 : vector<1x128xf32> to vector<4x128xf32>
      %53 = arith.addf %50, %52 : vector<4x128xf32>
      %c2_37 = arith.constant 2 : index
      %c0_38 = arith.constant 0 : index
      %c0_39 = arith.constant 0 : index
      %54 = vector.load %arg13[%c2_37, %c0_38, %c0_39] : memref<4x4x128xf32, #tpu.memory_space<vmem>>, vector<1x4x128xf32>
      %55 = vector.shape_cast %54 : vector<1x4x128xf32> to vector<4x128xf32>
      %56 = vector.shape_cast %53 : vector<4x128xf32> to vector<1x4x128xf32>
      tpu.vector_store %arg13[%c2_37, %c0_38, %c0_39], %56 {strides = array<i32>} : memref<4x4x128xf32, #tpu.memory_space<vmem>>, vector<1x4x128xf32>,
      %c3 = arith.constant 3 : index
      %c0_40 = arith.constant 0 : index
      %c0_41 = arith.constant 0 : index
      %57 = vector.load %arg6[%c3, %c0_40, %c0_41] : memref<4x4x16xf32, #tpu.memory_space<vmem>>, vector<1x4x16xf32>
      %58 = vector.shape_cast %57 : vector<1x4x16xf32> to vector<4x16xf32>
      %59 = arith.truncf %58 : vector<4x16xf32> to vector<4x16xbf16>
      %c0_42 = arith.constant 0 : index
      %c0_43 = arith.constant 0 : index
      %60 = vector.load %arg7[%c0_42, %c0_43] : memref<16x128xbf16, #tpu.memory_space<vmem>>, vector<16x128xbf16>
      %cst_44 = arith.constant dense<0.000000e+00> : vector<4x128xf32>
      %61 = tpu.matmul %59, %60, %cst_44 {dimension_numbers = #tpu.dot_dimension_numbers<[1], [0], [0], [1], [0, 0, 1, 1], [], []>} : vector<4x16xbf16>, vector<16x128xbf16>, vector<4x128xf32> -> vector<4x128xf32>
      %c0_45 = arith.constant 0 : index
      %c0_46 = arith.constant 0 : index
      %62 = vector.load %arg9[%c0_45, %c0_46] : memref<1x128xf32, #tpu.memory_space<vmem>>, vector<1x128xf32>
      %63 = vector.broadcast %62 : vector<1x128xf32> to vector<4x128xf32>
      %64 = arith.addf %61, %63 : vector<4x128xf32>
      %c3_47 = arith.constant 3 : index
      %c0_48 = arith.constant 0 : index
      %c0_49 = arith.constant 0 : index
      %65 = vector.load %arg13[%c3_47, %c0_48, %c0_49] : memref<4x4x128xf32, #tpu.memory_space<vmem>>, vector<1x4x128xf32>
      %66 = vector.shape_cast %65 : vector<1x4x128xf32> to vector<4x128xf32>
      %67 = vector.shape_cast %64 : vector<4x128xf32> to vector<1x4x128xf32>
      tpu.vector_store %arg13[%c3_47, %c0_48, %c0_49], %67 {strides = array<i32>} : memref<4x4x128xf32, #tpu.memory_space<vmem>>, vector<1x4x128xf32>,
      %c0_50 = arith.constant 0 : index
      %c0_51 = arith.constant 0 : index
      %68 = vector.load %arg14[%c0_50, %c0_51] : memref<4x32xf32, #tpu.memory_space<vmem>>, vector<4x32xf32>
      %c0_52 = arith.constant 0 : index
      %c0_53 = arith.constant 0 : index
      %69 = vector.load %arg15[%c0_52, %c0_53] : memref<4x32xf32, #tpu.memory_space<vmem>>, vector<4x32xf32>
      %c0_i32_54 = arith.constant 0 : i32
      %70 = arith.index_cast %c0_i32_54 : i32 to index
      %c0_55 = arith.constant 0 : index
      %c0_56 = arith.constant 0 : index
      %71 = vector.load %arg13[%70, %c0_55, %c0_56] : memref<4x4x128xf32, #tpu.memory_space<vmem>>, vector<1x4x128xf32>
      %72 = vector.shape_cast %71 : vector<1x4x128xf32> to vector<4x128xf32>
      %73 = arith.truncf %68 : vector<4x32xf32> to vector<4x32xbf16>
      %c0_57 = arith.constant 0 : index
      %c0_58 = arith.constant 0 : index
      %74 = vector.load %arg8[%c0_57, %c0_58] : memref<32x128xbf16, #tpu.memory_space<vmem>>, vector<32x128xbf16>
      %cst_59 = arith.constant dense<0.000000e+00> : vector<4x128xf32>
      %75 = tpu.matmul %73, %74, %cst_59 {dimension_numbers = #tpu.dot_dimension_numbers<[1], [0], [0], [1], [0, 0, 1, 1], [], []>} : vector<4x32xbf16>, vector<32x128xbf16>, vector<4x128xf32> -> vector<4x128xf32>
      %76 = arith.addf %72, %75 : vector<4x128xf32>
      %77 = vector.extract_strided_slice %76 {offsets = [0, 0], sizes = [4, 96], strides = [1, 1]} : vector<4x128xf32> to vector<4x96xf32>
      %cst_60 = arith.constant 5.000000e-01 : f32
      %78 = vector.broadcast %cst_60 : f32 to vector<4x96xf32>
      %79 = arith.mulf %78, %77 : vector<4x96xf32>
      %80 = math.tanh %79 : vector<4x96xf32>
      %cst_61 = arith.constant 5.000000e-01 : f32
      %81 = vector.broadcast %cst_61 : f32 to vector<4x96xf32>
      %82 = arith.mulf %81, %80 : vector<4x96xf32>
      %cst_62 = arith.constant 5.000000e-01 : f32
      %83 = vector.broadcast %cst_62 : f32 to vector<4x96xf32>
      %84 = arith.addf %82, %83 : vector<4x96xf32>
      %85 = vector.extract_strided_slice %76 {offsets = [0, 96], sizes = [4, 32], strides = [1, 1]} : vector<4x128xf32> to vector<4x32xf32>
      %86 = math.tanh %85 : vector<4x32xf32>
      %87 = vector.extract_strided_slice %84 {offsets = [0, 0], sizes = [4, 32], strides = [1, 1]} : vector<4x96xf32> to vector<4x32xf32>
      %88 = vector.extract_strided_slice %84 {offsets = [0, 32], sizes = [4, 32], strides = [1, 1]} : vector<4x96xf32> to vector<4x32xf32>
      %89 = vector.extract_strided_slice %84 {offsets = [0, 64], sizes = [4, 32], strides = [1, 1]} : vector<4x96xf32> to vector<4x32xf32>
      %90 = arith.mulf %88, %69 : vector<4x32xf32>
      %91 = arith.mulf %87, %86 : vector<4x32xf32>
      %92 = arith.addf %90, %91 : vector<4x32xf32>
      %93 = math.tanh %92 : vector<4x32xf32>
      %94 = arith.mulf %89, %93 : vector<4x32xf32>
      %95 = arith.truncf %94 : vector<4x32xf32> to vector<4x32xbf16>
      %96 = arith.index_cast %c0_i32_54 : i32 to index
      %c0_63 = arith.constant 0 : index
      %c0_64 = arith.constant 0 : index
      %97 = vector.load %arg10[%96, %c0_63, %c0_64] : memref<4x4x32xbf16, #tpu.memory_space<vmem>>, vector<1x4x32xbf16>
      %98 = vector.shape_cast %97 : vector<1x4x32xbf16> to vector<4x32xbf16>
      %99 = vector.shape_cast %95 : vector<4x32xbf16> to vector<1x4x32xbf16>
      tpu.vector_store %arg10[%96, %c0_63, %c0_64], %99 {strides = array<i32>} : memref<4x4x32xbf16, #tpu.memory_space<vmem>>, vector<1x4x32xbf16>,
      %c1_i32 = arith.constant 1 : i32
      %100 = arith.index_cast %c1_i32 : i32 to index
      %c0_65 = arith.constant 0 : index
      %c0_66 = arith.constant 0 : index
      %101 = vector.load %arg13[%100, %c0_65, %c0_66] : memref<4x4x128xf32, #tpu.memory_space<vmem>>, vector<1x4x128xf32>
      %102 = vector.shape_cast %101 : vector<1x4x128xf32> to vector<4x128xf32>
      %103 = arith.truncf %94 : vector<4x32xf32> to vector<4x32xbf16>
      %c0_67 = arith.constant 0 : index
      %c0_68 = arith.constant 0 : index
      %104 = vector.load %arg8[%c0_67, %c0_68] : memref<32x128xbf16, #tpu.memory_space<vmem>>, vector<32x128xbf16>
      %cst_69 = arith.constant dense<0.000000e+00> : vector<4x128xf32>
      %105 = tpu.matmul %103, %104, %cst_69 {dimension_numbers = #tpu.dot_dimension_numbers<[1], [0], [0], [1], [0, 0, 1, 1], [], []>} : vector<4x32xbf16>, vector<32x128xbf16>, vector<4x128xf32> -> vector<4x128xf32>
      %106 = arith.addf %102, %105 : vector<4x128xf32>
      %107 = vector.extract_strided_slice %106 {offsets = [0, 0], sizes = [4, 96], strides = [1, 1]} : vector<4x128xf32> to vector<4x96xf32>
      %cst_70 = arith.constant 5.000000e-01 : f32
      %108 = vector.broadcast %cst_70 : f32 to vector<4x96xf32>
      %109 = arith.mulf %108, %107 : vector<4x96xf32>
      %110 = math.tanh %109 : vector<4x96xf32>
      %cst_71 = arith.constant 5.000000e-01 : f32
      %111 = vector.broadcast %cst_71 : f32 to vector<4x96xf32>
      %112 = arith.mulf %111, %110 : vector<4x96xf32>
      %cst_72 = arith.constant 5.000000e-01 : f32
      %113 = vector.broadcast %cst_72 : f32 to vector<4x96xf32>
      %114 = arith.addf %112, %113 : vector<4x96xf32>
      %115 = vector.extract_strided_slice %106 {offsets = [0, 96], sizes = [4, 32], strides = [1, 1]} : vector<4x128xf32> to vector<4x32xf32>
      %116 = math.tanh %115 : vector<4x32xf32>
      %117 = vector.extract_strided_slice %114 {offsets = [0, 0], sizes = [4, 32], strides = [1, 1]} : vector<4x96xf32> to vector<4x32xf32>
      %118 = vector.extract_strided_slice %114 {offsets = [0, 32], sizes = [4, 32], strides = [1, 1]} : vector<4x96xf32> to vector<4x32xf32>
      %119 = vector.extract_strided_slice %114 {offsets = [0, 64], sizes = [4, 32], strides = [1, 1]} : vector<4x96xf32> to vector<4x32xf32>
      %120 = arith.mulf %118, %92 : vector<4x32xf32>
      %121 = arith.mulf %117, %116 : vector<4x32xf32>
      %122 = arith.addf %120, %121 : vector<4x32xf32>
      %123 = math.tanh %122 : vector<4x32xf32>
      %124 = arith.mulf %119, %123 : vector<4x32xf32>
      %125 = arith.truncf %124 : vector<4x32xf32> to vector<4x32xbf16>
      %126 = arith.index_cast %c1_i32 : i32 to index
      %c0_73 = arith.constant 0 : index
      %c0_74 = arith.constant 0 : index
      %127 = vector.load %arg10[%126, %c0_73, %c0_74] : memref<4x4x32xbf16, #tpu.memory_space<vmem>>, vector<1x4x32xbf16>
      %128 = vector.shape_cast %127 : vector<1x4x32xbf16> to vector<4x32xbf16>
      %129 = vector.shape_cast %125 : vector<4x32xbf16> to vector<1x4x32xbf16>
      tpu.vector_store %arg10[%126, %c0_73, %c0_74], %129 {strides = array<i32>} : memref<4x4x32xbf16, #tpu.memory_space<vmem>>, vector<1x4x32xbf16>,
      %c2_i32_75 = arith.constant 2 : i32
      %130 = arith.index_cast %c2_i32_75 : i32 to index
      %c0_76 = arith.constant 0 : index
      %c0_77 = arith.constant 0 : index
      %131 = vector.load %arg13[%130, %c0_76, %c0_77] : memref<4x4x128xf32, #tpu.memory_space<vmem>>, vector<1x4x128xf32>
      %132 = vector.shape_cast %131 : vector<1x4x128xf32> to vector<4x128xf32>
      %133 = arith.truncf %124 : vector<4x32xf32> to vector<4x32xbf16>
      %c0_78 = arith.constant 0 : index
      %c0_79 = arith.constant 0 : index
      %134 = vector.load %arg8[%c0_78, %c0_79] : memref<32x128xbf16, #tpu.memory_space<vmem>>, vector<32x128xbf16>
      %cst_80 = arith.constant dense<0.000000e+00> : vector<4x128xf32>
      %135 = tpu.matmul %133, %134, %cst_80 {dimension_numbers = #tpu.dot_dimension_numbers<[1], [0], [0], [1], [0, 0, 1, 1], [], []>} : vector<4x32xbf16>, vector<32x128xbf16>, vector<4x128xf32> -> vector<4x128xf32>
      %136 = arith.addf %132, %135 : vector<4x128xf32>
      %137 = vector.extract_strided_slice %136 {offsets = [0, 0], sizes = [4, 96], strides = [1, 1]} : vector<4x128xf32> to vector<4x96xf32>
      %cst_81 = arith.constant 5.000000e-01 : f32
      %138 = vector.broadcast %cst_81 : f32 to vector<4x96xf32>
      %139 = arith.mulf %138, %137 : vector<4x96xf32>
      %140 = math.tanh %139 : vector<4x96xf32>
      %cst_82 = arith.constant 5.000000e-01 : f32
      %141 = vector.broadcast %cst_82 : f32 to vector<4x96xf32>
      %142 = arith.mulf %141, %140 : vector<4x96xf32>
      %cst_83 = arith.constant 5.000000e-01 : f32
      %143 = vector.broadcast %cst_83 : f32 to vector<4x96xf32>
      %144 = arith.addf %142, %143 : vector<4x96xf32>
      %145 = vector.extract_strided_slice %136 {offsets = [0, 96], sizes = [4, 32], strides = [1, 1]} : vector<4x128xf32> to vector<4x32xf32>
      %146 = math.tanh %145 : vector<4x32xf32>
      %147 = vector.extract_strided_slice %144 {offsets = [0, 0], sizes = [4, 32], strides = [1, 1]} : vector<4x96xf32> to vector<4x32xf32>
      %148 = vector.extract_strided_slice %144 {offsets = [0, 32], sizes = [4, 32], strides = [1, 1]} : vector<4x96xf32> to vector<4x32xf32>
      %149 = vector.extract_strided_slice %144 {offsets = [0, 64], sizes = [4, 32], strides = [1, 1]} : vector<4x96xf32> to vector<4x32xf32>
      %150 = arith.mulf %148, %122 : vector<4x32xf32>
      %151 = arith.mulf %147, %146 : vector<4x32xf32>
      %152 = arith.addf %150, %151 : vector<4x32xf32>
      %153 = math.tanh %152 : vector<4x32xf32>
      %154 = arith.mulf %149, %153 : vector<4x32xf32>
      %155 = arith.truncf %154 : vector<4x32xf32> to vector<4x32xbf16>
      %156 = arith.index_cast %c2_i32_75 : i32 to index
      %c0_84 = arith.constant 0 : index
      %c0_85 = arith.constant 0 : index
      %157 = vector.load %arg10[%156, %c0_84, %c0_85] : memref<4x4x32xbf16, #tpu.memory_space<vmem>>, vector<1x4x32xbf16>
      %158 = vector.shape_cast %157 : vector<1x4x32xbf16> to vector<4x32xbf16>
      %159 = vector.shape_cast %155 : vector<4x32xbf16> to vector<1x4x32xbf16>
      tpu.vector_store %arg10[%156, %c0_84, %c0_85], %159 {strides = array<i32>} : memref<4x4x32xbf16, #tpu.memory_space<vmem>>, vector<1x4x32xbf16>,
      %c3_i32 = arith.constant 3 : i32
      %160 = arith.index_cast %c3_i32 : i32 to index
      %c0_86 = arith.constant 0 : index
      %c0_87 = arith.constant 0 : index
      %161 = vector.load %arg13[%160, %c0_86, %c0_87] : memref<4x4x128xf32, #tpu.memory_space<vmem>>, vector<1x4x128xf32>
      %162 = vector.shape_cast %161 : vector<1x4x128xf32> to vector<4x128xf32>
      %163 = arith.truncf %154 : vector<4x32xf32> to vector<4x32xbf16>
      %c0_88 = arith.constant 0 : index
      %c0_89 = arith.constant 0 : index
      %164 = vector.load %arg8[%c0_88, %c0_89] : memref<32x128xbf16, #tpu.memory_space<vmem>>, vector<32x128xbf16>
      %cst_90 = arith.constant dense<0.000000e+00> : vector<4x128xf32>
      %165 = tpu.matmul %163, %164, %cst_90 {dimension_numbers = #tpu.dot_dimension_numbers<[1], [0], [0], [1], [0, 0, 1, 1], [], []>} : vector<4x32xbf16>, vector<32x128xbf16>, vector<4x128xf32> -> vector<4x128xf32>
      %166 = arith.addf %162, %165 : vector<4x128xf32>
      %167 = vector.extract_strided_slice %166 {offsets = [0, 0], sizes = [4, 96], strides = [1, 1]} : vector<4x128xf32> to vector<4x96xf32>
      %cst_91 = arith.constant 5.000000e-01 : f32
      %168 = vector.broadcast %cst_91 : f32 to vector<4x96xf32>
      %169 = arith.mulf %168, %167 : vector<4x96xf32>
      %170 = math.tanh %169 : vector<4x96xf32>
      %cst_92 = arith.constant 5.000000e-01 : f32
      %171 = vector.broadcast %cst_92 : f32 to vector<4x96xf32>
      %172 = arith.mulf %171, %170 : vector<4x96xf32>
      %cst_93 = arith.constant 5.000000e-01 : f32
      %173 = vector.broadcast %cst_93 : f32 to vector<4x96xf32>
      %174 = arith.addf %172, %173 : vector<4x96xf32>
      %175 = vector.extract_strided_slice %166 {offsets = [0, 96], sizes = [4, 32], strides = [1, 1]} : vector<4x128xf32> to vector<4x32xf32>
      %176 = math.tanh %175 : vector<4x32xf32>
      %177 = vector.extract_strided_slice %174 {offsets = [0, 0], sizes = [4, 32], strides = [1, 1]} : vector<4x96xf32> to vector<4x32xf32>
      %178 = vector.extract_strided_slice %174 {offsets = [0, 32], sizes = [4, 32], strides = [1, 1]} : vector<4x96xf32> to vector<4x32xf32>
      %179 = vector.extract_strided_slice %174 {offsets = [0, 64], sizes = [4, 32], strides = [1, 1]} : vector<4x96xf32> to vector<4x32xf32>
      %180 = arith.mulf %178, %152 : vector<4x32xf32>
      %181 = arith.mulf %177, %176 : vector<4x32xf32>
      %182 = arith.addf %180, %181 : vector<4x32xf32>
      %183 = math.tanh %182 : vector<4x32xf32>
      %184 = arith.mulf %179, %183 : vector<4x32xf32>
      %185 = arith.truncf %184 : vector<4x32xf32> to vector<4x32xbf16>
      %186 = arith.index_cast %c3_i32 : i32 to index
      %c0_94 = arith.constant 0 : index
      %c0_95 = arith.constant 0 : index
      %187 = vector.load %arg10[%186, %c0_94, %c0_95] : memref<4x4x32xbf16, #tpu.memory_space<vmem>>, vector<1x4x32xbf16>
      %188 = vector.shape_cast %187 : vector<1x4x32xbf16> to vector<4x32xbf16>
      %189 = vector.shape_cast %185 : vector<4x32xbf16> to vector<1x4x32xbf16>
      tpu.vector_store %arg10[%186, %c0_94, %c0_95], %189 {strides = array<i32>} : memref<4x4x32xbf16, #tpu.memory_space<vmem>>, vector<1x4x32xbf16>,
      %c4_i32_96 = arith.constant 4 : i32
      %c0_97 = arith.constant 0 : index
      %c0_98 = arith.constant 0 : index
      %190 = vector.load %arg14[%c0_97, %c0_98] : memref<4x32xf32, #tpu.memory_space<vmem>>, vector<4x32xf32>
      tpu.vector_store %arg14[%c0_97, %c0_98], %184 {strides = array<i32>} : memref<4x32xf32, #tpu.memory_space<vmem>>, vector<4x32xf32>,
      %c0_99 = arith.constant 0 : index
      %c0_100 = arith.constant 0 : index
      %191 = vector.load %arg15[%c0_99, %c0_100] : memref<4x32xf32, #tpu.memory_space<vmem>>, vector<4x32xf32>
      tpu.vector_store %arg15[%c0_99, %c0_100], %182 {strides = array<i32>} : memref<4x32xf32, #tpu.memory_space<vmem>>, vector<4x32xf32>,
    } else {
    }
    %true = arith.constant true
    %16 = arith.xori %10, %true : i1
    %true_6 = arith.constant true
    %17 = arith.xori %11, %true_6 : i1
    %18 = arith.andi %16, %17 : i1
    %19 = arith.extui %18 : i1 to i32
    %c0_i32_7 = arith.constant 0 : i32
    %20 = arith.cmpi ne, %19, %c0_i32_7 : i32
    scf.if %20 {
      %c0_9 = arith.constant 0 : index
      %c0_10 = arith.constant 0 : index
      %c0_11 = arith.constant 0 : index
      %24 = vector.load %arg6[%c0_9, %c0_10, %c0_11] : memref<4x4x16xf32, #tpu.memory_space<vmem>>, vector<1x4x16xf32>
      %25 = vector.shape_cast %24 : vector<1x4x16xf32> to vector<4x16xf32>
      %26 = arith.truncf %25 : vector<4x16xf32> to vector<4x16xbf16>
      %c0_12 = arith.constant 0 : index
      %c0_13 = arith.constant 0 : index
      %27 = vector.load %arg7[%c0_12, %c0_13] : memref<16x128xbf16, #tpu.memory_space<vmem>>, vector<16x128xbf16>
      %cst = arith.constant dense<0.000000e+00> : vector<4x128xf32>
      %28 = tpu.matmul %26, %27, %cst {dimension_numbers = #tpu.dot_dimension_numbers<[1], [0], [0], [1], [0, 0, 1, 1], [], []>} : vector<4x16xbf16>, vector<16x128xbf16>, vector<4x128xf32> -> vector<4x128xf32>
      %c0_14 = arith.constant 0 : index
      %c0_15 = arith.constant 0 : index
      %29 = vector.load %arg9[%c0_14, %c0_15] : memref<1x128xf32, #tpu.memory_space<vmem>>, vector<1x128xf32>
      %30 = vector.broadcast %29 : vector<1x128xf32> to vector<4x128xf32>
      %31 = arith.addf %28, %30 : vector<4x128xf32>
      %c0_16 = arith.constant 0 : index
      %c0_17 = arith.constant 0 : index
      %c0_18 = arith.constant 0 : index
      %32 = vector.load %arg13[%c0_16, %c0_17, %c0_18] : memref<4x4x128xf32, #tpu.memory_space<vmem>>, vector<1x4x128xf32>
      %33 = vector.shape_cast %32 : vector<1x4x128xf32> to vector<4x128xf32>
      %34 = vector.shape_cast %31 : vector<4x128xf32> to vector<1x4x128xf32>
      tpu.vector_store %arg13[%c0_16, %c0_17, %c0_18], %34 {strides = array<i32>} : memref<4x4x128xf32, #tpu.memory_space<vmem>>, vector<1x4x128xf32>,
      %c1_19 = arith.constant 1 : index
      %c0_20 = arith.constant 0 : index
      %c0_21 = arith.constant 0 : index
      %35 = vector.load %arg6[%c1_19, %c0_20, %c0_21] : memref<4x4x16xf32, #tpu.memory_space<vmem>>, vector<1x4x16xf32>
      %36 = vector.shape_cast %35 : vector<1x4x16xf32> to vector<4x16xf32>
      %37 = arith.truncf %36 : vector<4x16xf32> to vector<4x16xbf16>
      %c0_22 = arith.constant 0 : index
      %c0_23 = arith.constant 0 : index
      %38 = vector.load %arg7[%c0_22, %c0_23] : memref<16x128xbf16, #tpu.memory_space<vmem>>, vector<16x128xbf16>
      %cst_24 = arith.constant dense<0.000000e+00> : vector<4x128xf32>
      %39 = tpu.matmul %37, %38, %cst_24 {dimension_numbers = #tpu.dot_dimension_numbers<[1], [0], [0], [1], [0, 0, 1, 1], [], []>} : vector<4x16xbf16>, vector<16x128xbf16>, vector<4x128xf32> -> vector<4x128xf32>
      %c0_25 = arith.constant 0 : index
      %c0_26 = arith.constant 0 : index
      %40 = vector.load %arg9[%c0_25, %c0_26] : memref<1x128xf32, #tpu.memory_space<vmem>>, vector<1x128xf32>
      %41 = vector.broadcast %40 : vector<1x128xf32> to vector<4x128xf32>
      %42 = arith.addf %39, %41 : vector<4x128xf32>
      %c1_27 = arith.constant 1 : index
      %c0_28 = arith.constant 0 : index
      %c0_29 = arith.constant 0 : index
      %43 = vector.load %arg13[%c1_27, %c0_28, %c0_29] : memref<4x4x128xf32, #tpu.memory_space<vmem>>, vector<1x4x128xf32>
      %44 = vector.shape_cast %43 : vector<1x4x128xf32> to vector<4x128xf32>
      %45 = vector.shape_cast %42 : vector<4x128xf32> to vector<1x4x128xf32>
      tpu.vector_store %arg13[%c1_27, %c0_28, %c0_29], %45 {strides = array<i32>} : memref<4x4x128xf32, #tpu.memory_space<vmem>>, vector<1x4x128xf32>,
      %c2 = arith.constant 2 : index
      %c0_30 = arith.constant 0 : index
      %c0_31 = arith.constant 0 : index
      %46 = vector.load %arg6[%c2, %c0_30, %c0_31] : memref<4x4x16xf32, #tpu.memory_space<vmem>>, vector<1x4x16xf32>
      %47 = vector.shape_cast %46 : vector<1x4x16xf32> to vector<4x16xf32>
      %48 = arith.truncf %47 : vector<4x16xf32> to vector<4x16xbf16>
      %c0_32 = arith.constant 0 : index
      %c0_33 = arith.constant 0 : index
      %49 = vector.load %arg7[%c0_32, %c0_33] : memref<16x128xbf16, #tpu.memory_space<vmem>>, vector<16x128xbf16>
      %cst_34 = arith.constant dense<0.000000e+00> : vector<4x128xf32>
      %50 = tpu.matmul %48, %49, %cst_34 {dimension_numbers = #tpu.dot_dimension_numbers<[1], [0], [0], [1], [0, 0, 1, 1], [], []>} : vector<4x16xbf16>, vector<16x128xbf16>, vector<4x128xf32> -> vector<4x128xf32>
      %c0_35 = arith.constant 0 : index
      %c0_36 = arith.constant 0 : index
      %51 = vector.load %arg9[%c0_35, %c0_36] : memref<1x128xf32, #tpu.memory_space<vmem>>, vector<1x128xf32>
      %52 = vector.broadcast %51 : vector<1x128xf32> to vector<4x128xf32>
      %53 = arith.addf %50, %52 : vector<4x128xf32>
      %c2_37 = arith.constant 2 : index
      %c0_38 = arith.constant 0 : index
      %c0_39 = arith.constant 0 : index
      %54 = vector.load %arg13[%c2_37, %c0_38, %c0_39] : memref<4x4x128xf32, #tpu.memory_space<vmem>>, vector<1x4x128xf32>
      %55 = vector.shape_cast %54 : vector<1x4x128xf32> to vector<4x128xf32>
      %56 = vector.shape_cast %53 : vector<4x128xf32> to vector<1x4x128xf32>
      tpu.vector_store %arg13[%c2_37, %c0_38, %c0_39], %56 {strides = array<i32>} : memref<4x4x128xf32, #tpu.memory_space<vmem>>, vector<1x4x128xf32>,
      %c3 = arith.constant 3 : index
      %c0_40 = arith.constant 0 : index
      %c0_41 = arith.constant 0 : index
      %57 = vector.load %arg6[%c3, %c0_40, %c0_41] : memref<4x4x16xf32, #tpu.memory_space<vmem>>, vector<1x4x16xf32>
      %58 = vector.shape_cast %57 : vector<1x4x16xf32> to vector<4x16xf32>
      %59 = arith.truncf %58 : vector<4x16xf32> to vector<4x16xbf16>
      %c0_42 = arith.constant 0 : index
      %c0_43 = arith.constant 0 : index
      %60 = vector.load %arg7[%c0_42, %c0_43] : memref<16x128xbf16, #tpu.memory_space<vmem>>, vector<16x128xbf16>
      %cst_44 = arith.constant dense<0.000000e+00> : vector<4x128xf32>
      %61 = tpu.matmul %59, %60, %cst_44 {dimension_numbers = #tpu.dot_dimension_numbers<[1], [0], [0], [1], [0, 0, 1, 1], [], []>} : vector<4x16xbf16>, vector<16x128xbf16>, vector<4x128xf32> -> vector<4x128xf32>
      %c0_45 = arith.constant 0 : index
      %c0_46 = arith.constant 0 : index
      %62 = vector.load %arg9[%c0_45, %c0_46] : memref<1x128xf32, #tpu.memory_space<vmem>>, vector<1x128xf32>
      %63 = vector.broadcast %62 : vector<1x128xf32> to vector<4x128xf32>
      %64 = arith.addf %61, %63 : vector<4x128xf32>
      %c3_47 = arith.constant 3 : index
      %c0_48 = arith.constant 0 : index
      %c0_49 = arith.constant 0 : index
      %65 = vector.load %arg13[%c3_47, %c0_48, %c0_49] : memref<4x4x128xf32, #tpu.memory_space<vmem>>, vector<1x4x128xf32>
      %66 = vector.shape_cast %65 : vector<1x4x128xf32> to vector<4x128xf32>
      %67 = vector.shape_cast %64 : vector<4x128xf32> to vector<1x4x128xf32>
      tpu.vector_store %arg13[%c3_47, %c0_48, %c0_49], %67 {strides = array<i32>} : memref<4x4x128xf32, #tpu.memory_space<vmem>>, vector<1x4x128xf32>,
      %c0_50 = arith.constant 0 : index
      %c0_51 = arith.constant 0 : index
      %68 = vector.load %arg14[%c0_50, %c0_51] : memref<4x32xf32, #tpu.memory_space<vmem>>, vector<4x32xf32>
      %c0_52 = arith.constant 0 : index
      %c0_53 = arith.constant 0 : index
      %69 = vector.load %arg15[%c0_52, %c0_53] : memref<4x32xf32, #tpu.memory_space<vmem>>, vector<4x32xf32>
      %c0_i32_54 = arith.constant 0 : i32
      %70 = arith.index_cast %c0_i32_54 : i32 to index
      %c0_55 = arith.constant 0 : index
      %c0_56 = arith.constant 0 : index
      %71 = vector.load %arg13[%70, %c0_55, %c0_56] : memref<4x4x128xf32, #tpu.memory_space<vmem>>, vector<1x4x128xf32>
      %72 = vector.shape_cast %71 : vector<1x4x128xf32> to vector<4x128xf32>
      %73 = arith.truncf %68 : vector<4x32xf32> to vector<4x32xbf16>
      %c0_57 = arith.constant 0 : index
      %c0_58 = arith.constant 0 : index
      %74 = vector.load %arg8[%c0_57, %c0_58] : memref<32x128xbf16, #tpu.memory_space<vmem>>, vector<32x128xbf16>
      %cst_59 = arith.constant dense<0.000000e+00> : vector<4x128xf32>
      %75 = tpu.matmul %73, %74, %cst_59 {dimension_numbers = #tpu.dot_dimension_numbers<[1], [0], [0], [1], [0, 0, 1, 1], [], []>} : vector<4x32xbf16>, vector<32x128xbf16>, vector<4x128xf32> -> vector<4x128xf32>
      %76 = arith.addf %72, %75 : vector<4x128xf32>
      %77 = vector.extract_strided_slice %76 {offsets = [0, 0], sizes = [4, 96], strides = [1, 1]} : vector<4x128xf32> to vector<4x96xf32>
      %cst_60 = arith.constant 5.000000e-01 : f32
      %78 = vector.broadcast %cst_60 : f32 to vector<4x96xf32>
      %79 = arith.mulf %78, %77 : vector<4x96xf32>
      %80 = math.tanh %79 : vector<4x96xf32>
      %cst_61 = arith.constant 5.000000e-01 : f32
      %81 = vector.broadcast %cst_61 : f32 to vector<4x96xf32>
      %82 = arith.mulf %81, %80 : vector<4x96xf32>
      %cst_62 = arith.constant 5.000000e-01 : f32
      %83 = vector.broadcast %cst_62 : f32 to vector<4x96xf32>
      %84 = arith.addf %82, %83 : vector<4x96xf32>
      %85 = vector.extract_strided_slice %76 {offsets = [0, 96], sizes = [4, 32], strides = [1, 1]} : vector<4x128xf32> to vector<4x32xf32>
      %86 = math.tanh %85 : vector<4x32xf32>
      %87 = vector.extract_strided_slice %84 {offsets = [0, 0], sizes = [4, 32], strides = [1, 1]} : vector<4x96xf32> to vector<4x32xf32>
      %88 = vector.extract_strided_slice %84 {offsets = [0, 32], sizes = [4, 32], strides = [1, 1]} : vector<4x96xf32> to vector<4x32xf32>
      %89 = vector.extract_strided_slice %84 {offsets = [0, 64], sizes = [4, 32], strides = [1, 1]} : vector<4x96xf32> to vector<4x32xf32>
      %90 = arith.mulf %88, %69 : vector<4x32xf32>
      %91 = arith.mulf %87, %86 : vector<4x32xf32>
      %92 = arith.addf %90, %91 : vector<4x32xf32>
      %93 = math.tanh %92 : vector<4x32xf32>
      %94 = arith.mulf %89, %93 : vector<4x32xf32>
      %95 = arith.addi %0, %c0_i32_54 : i32
      %96 = vector.broadcast %95 : i32 to vector<4x32xi32>
      %97 = arith.cmpi sgt, %8, %96 : vector<4x32xi32>
      %98 = arith.select %97, %94, %68 : vector<4x32xi1>, vector<4x32xf32>
      %99 = arith.select %97, %92, %69 : vector<4x32xi1>, vector<4x32xf32>
      %100 = arith.truncf %98 : vector<4x32xf32> to vector<4x32xbf16>
      %101 = arith.index_cast %c0_i32_54 : i32 to index
      %c0_63 = arith.constant 0 : index
      %c0_64 = arith.constant 0 : index
      %102 = vector.load %arg10[%101, %c0_63, %c0_64] : memref<4x4x32xbf16, #tpu.memory_space<vmem>>, vector<1x4x32xbf16>
      %103 = vector.shape_cast %102 : vector<1x4x32xbf16> to vector<4x32xbf16>
      %104 = vector.shape_cast %100 : vector<4x32xbf16> to vector<1x4x32xbf16>
      tpu.vector_store %arg10[%101, %c0_63, %c0_64], %104 {strides = array<i32>} : memref<4x4x32xbf16, #tpu.memory_space<vmem>>, vector<1x4x32xbf16>,
      %c1_i32 = arith.constant 1 : i32
      %105 = arith.index_cast %c1_i32 : i32 to index
      %c0_65 = arith.constant 0 : index
      %c0_66 = arith.constant 0 : index
      %106 = vector.load %arg13[%105, %c0_65, %c0_66] : memref<4x4x128xf32, #tpu.memory_space<vmem>>, vector<1x4x128xf32>
      %107 = vector.shape_cast %106 : vector<1x4x128xf32> to vector<4x128xf32>
      %108 = arith.truncf %98 : vector<4x32xf32> to vector<4x32xbf16>
      %c0_67 = arith.constant 0 : index
      %c0_68 = arith.constant 0 : index
      %109 = vector.load %arg8[%c0_67, %c0_68] : memref<32x128xbf16, #tpu.memory_space<vmem>>, vector<32x128xbf16>
      %cst_69 = arith.constant dense<0.000000e+00> : vector<4x128xf32>
      %110 = tpu.matmul %108, %109, %cst_69 {dimension_numbers = #tpu.dot_dimension_numbers<[1], [0], [0], [1], [0, 0, 1, 1], [], []>} : vector<4x32xbf16>, vector<32x128xbf16>, vector<4x128xf32> -> vector<4x128xf32>
      %111 = arith.addf %107, %110 : vector<4x128xf32>
      %112 = vector.extract_strided_slice %111 {offsets = [0, 0], sizes = [4, 96], strides = [1, 1]} : vector<4x128xf32> to vector<4x96xf32>
      %cst_70 = arith.constant 5.000000e-01 : f32
      %113 = vector.broadcast %cst_70 : f32 to vector<4x96xf32>
      %114 = arith.mulf %113, %112 : vector<4x96xf32>
      %115 = math.tanh %114 : vector<4x96xf32>
      %cst_71 = arith.constant 5.000000e-01 : f32
      %116 = vector.broadcast %cst_71 : f32 to vector<4x96xf32>
      %117 = arith.mulf %116, %115 : vector<4x96xf32>
      %cst_72 = arith.constant 5.000000e-01 : f32
      %118 = vector.broadcast %cst_72 : f32 to vector<4x96xf32>
      %119 = arith.addf %117, %118 : vector<4x96xf32>
      %120 = vector.extract_strided_slice %111 {offsets = [0, 96], sizes = [4, 32], strides = [1, 1]} : vector<4x128xf32> to vector<4x32xf32>
      %121 = math.tanh %120 : vector<4x32xf32>
      %122 = vector.extract_strided_slice %119 {offsets = [0, 0], sizes = [4, 32], strides = [1, 1]} : vector<4x96xf32> to vector<4x32xf32>
      %123 = vector.extract_strided_slice %119 {offsets = [0, 32], sizes = [4, 32], strides = [1, 1]} : vector<4x96xf32> to vector<4x32xf32>
      %124 = vector.extract_strided_slice %119 {offsets = [0, 64], sizes = [4, 32], strides = [1, 1]} : vector<4x96xf32> to vector<4x32xf32>
      %125 = arith.mulf %123, %99 : vector<4x32xf32>
      %126 = arith.mulf %122, %121 : vector<4x32xf32>
      %127 = arith.addf %125, %126 : vector<4x32xf32>
      %128 = math.tanh %127 : vector<4x32xf32>
      %129 = arith.mulf %124, %128 : vector<4x32xf32>
      %130 = arith.addi %0, %c1_i32 : i32
      %131 = vector.broadcast %130 : i32 to vector<4x32xi32>
      %132 = arith.cmpi sgt, %8, %131 : vector<4x32xi32>
      %133 = arith.select %132, %129, %98 : vector<4x32xi1>, vector<4x32xf32>
      %134 = arith.select %132, %127, %99 : vector<4x32xi1>, vector<4x32xf32>
      %135 = arith.truncf %133 : vector<4x32xf32> to vector<4x32xbf16>
      %136 = arith.index_cast %c1_i32 : i32 to index
      %c0_73 = arith.constant 0 : index
      %c0_74 = arith.constant 0 : index
      %137 = vector.load %arg10[%136, %c0_73, %c0_74] : memref<4x4x32xbf16, #tpu.memory_space<vmem>>, vector<1x4x32xbf16>
      %138 = vector.shape_cast %137 : vector<1x4x32xbf16> to vector<4x32xbf16>
      %139 = vector.shape_cast %135 : vector<4x32xbf16> to vector<1x4x32xbf16>
      tpu.vector_store %arg10[%136, %c0_73, %c0_74], %139 {strides = array<i32>} : memref<4x4x32xbf16, #tpu.memory_space<vmem>>, vector<1x4x32xbf16>,
      %c2_i32_75 = arith.constant 2 : i32
      %140 = arith.index_cast %c2_i32_75 : i32 to index
      %c0_76 = arith.constant 0 : index
      %c0_77 = arith.constant 0 : index
      %141 = vector.load %arg13[%140, %c0_76, %c0_77] : memref<4x4x128xf32, #tpu.memory_space<vmem>>, vector<1x4x128xf32>
      %142 = vector.shape_cast %141 : vector<1x4x128xf32> to vector<4x128xf32>
      %143 = arith.truncf %133 : vector<4x32xf32> to vector<4x32xbf16>
      %c0_78 = arith.constant 0 : index
      %c0_79 = arith.constant 0 : index
      %144 = vector.load %arg8[%c0_78, %c0_79] : memref<32x128xbf16, #tpu.memory_space<vmem>>, vector<32x128xbf16>
      %cst_80 = arith.constant dense<0.000000e+00> : vector<4x128xf32>
      %145 = tpu.matmul %143, %144, %cst_80 {dimension_numbers = #tpu.dot_dimension_numbers<[1], [0], [0], [1], [0, 0, 1, 1], [], []>} : vector<4x32xbf16>, vector<32x128xbf16>, vector<4x128xf32> -> vector<4x128xf32>
      %146 = arith.addf %142, %145 : vector<4x128xf32>
      %147 = vector.extract_strided_slice %146 {offsets = [0, 0], sizes = [4, 96], strides = [1, 1]} : vector<4x128xf32> to vector<4x96xf32>
      %cst_81 = arith.constant 5.000000e-01 : f32
      %148 = vector.broadcast %cst_81 : f32 to vector<4x96xf32>
      %149 = arith.mulf %148, %147 : vector<4x96xf32>
      %150 = math.tanh %149 : vector<4x96xf32>
      %cst_82 = arith.constant 5.000000e-01 : f32
      %151 = vector.broadcast %cst_82 : f32 to vector<4x96xf32>
      %152 = arith.mulf %151, %150 : vector<4x96xf32>
      %cst_83 = arith.constant 5.000000e-01 : f32
      %153 = vector.broadcast %cst_83 : f32 to vector<4x96xf32>
      %154 = arith.addf %152, %153 : vector<4x96xf32>
      %155 = vector.extract_strided_slice %146 {offsets = [0, 96], sizes = [4, 32], strides = [1, 1]} : vector<4x128xf32> to vector<4x32xf32>
      %156 = math.tanh %155 : vector<4x32xf32>
      %157 = vector.extract_strided_slice %154 {offsets = [0, 0], sizes = [4, 32], strides = [1, 1]} : vector<4x96xf32> to vector<4x32xf32>
      %158 = vector.extract_strided_slice %154 {offsets = [0, 32], sizes = [4, 32], strides = [1, 1]} : vector<4x96xf32> to vector<4x32xf32>
      %159 = vector.extract_strided_slice %154 {offsets = [0, 64], sizes = [4, 32], strides = [1, 1]} : vector<4x96xf32> to vector<4x32xf32>
      %160 = arith.mulf %158, %134 : vector<4x32xf32>
      %161 = arith.mulf %157, %156 : vector<4x32xf32>
      %162 = arith.addf %160, %161 : vector<4x32xf32>
      %163 = math.tanh %162 : vector<4x32xf32>
      %164 = arith.mulf %159, %163 : vector<4x32xf32>
      %165 = arith.addi %0, %c2_i32_75 : i32
      %166 = vector.broadcast %165 : i32 to vector<4x32xi32>
      %167 = arith.cmpi sgt, %8, %166 : vector<4x32xi32>
      %168 = arith.select %167, %164, %133 : vector<4x32xi1>, vector<4x32xf32>
      %169 = arith.select %167, %162, %134 : vector<4x32xi1>, vector<4x32xf32>
      %170 = arith.truncf %168 : vector<4x32xf32> to vector<4x32xbf16>
      %171 = arith.index_cast %c2_i32_75 : i32 to index
      %c0_84 = arith.constant 0 : index
      %c0_85 = arith.constant 0 : index
      %172 = vector.load %arg10[%171, %c0_84, %c0_85] : memref<4x4x32xbf16, #tpu.memory_space<vmem>>, vector<1x4x32xbf16>
      %173 = vector.shape_cast %172 : vector<1x4x32xbf16> to vector<4x32xbf16>
      %174 = vector.shape_cast %170 : vector<4x32xbf16> to vector<1x4x32xbf16>
      tpu.vector_store %arg10[%171, %c0_84, %c0_85], %174 {strides = array<i32>} : memref<4x4x32xbf16, #tpu.memory_space<vmem>>, vector<1x4x32xbf16>,
      %c3_i32 = arith.constant 3 : i32
      %175 = arith.index_cast %c3_i32 : i32 to index
      %c0_86 = arith.constant 0 : index
      %c0_87 = arith.constant 0 : index
      %176 = vector.load %arg13[%175, %c0_86, %c0_87] : memref<4x4x128xf32, #tpu.memory_space<vmem>>, vector<1x4x128xf32>
      %177 = vector.shape_cast %176 : vector<1x4x128xf32> to vector<4x128xf32>
      %178 = arith.truncf %168 : vector<4x32xf32> to vector<4x32xbf16>
      %c0_88 = arith.constant 0 : index
      %c0_89 = arith.constant 0 : index
      %179 = vector.load %arg8[%c0_88, %c0_89] : memref<32x128xbf16, #tpu.memory_space<vmem>>, vector<32x128xbf16>
      %cst_90 = arith.constant dense<0.000000e+00> : vector<4x128xf32>
      %180 = tpu.matmul %178, %179, %cst_90 {dimension_numbers = #tpu.dot_dimension_numbers<[1], [0], [0], [1], [0, 0, 1, 1], [], []>} : vector<4x32xbf16>, vector<32x128xbf16>, vector<4x128xf32> -> vector<4x128xf32>
      %181 = arith.addf %177, %180 : vector<4x128xf32>
      %182 = vector.extract_strided_slice %181 {offsets = [0, 0], sizes = [4, 96], strides = [1, 1]} : vector<4x128xf32> to vector<4x96xf32>
      %cst_91 = arith.constant 5.000000e-01 : f32
      %183 = vector.broadcast %cst_91 : f32 to vector<4x96xf32>
      %184 = arith.mulf %183, %182 : vector<4x96xf32>
      %185 = math.tanh %184 : vector<4x96xf32>
      %cst_92 = arith.constant 5.000000e-01 : f32
      %186 = vector.broadcast %cst_92 : f32 to vector<4x96xf32>
      %187 = arith.mulf %186, %185 : vector<4x96xf32>
      %cst_93 = arith.constant 5.000000e-01 : f32
      %188 = vector.broadcast %cst_93 : f32 to vector<4x96xf32>
      %189 = arith.addf %187, %188 : vector<4x96xf32>
      %190 = vector.extract_strided_slice %181 {offsets = [0, 96], sizes = [4, 32], strides = [1, 1]} : vector<4x128xf32> to vector<4x32xf32>
      %191 = math.tanh %190 : vector<4x32xf32>
      %192 = vector.extract_strided_slice %189 {offsets = [0, 0], sizes = [4, 32], strides = [1, 1]} : vector<4x96xf32> to vector<4x32xf32>
      %193 = vector.extract_strided_slice %189 {offsets = [0, 32], sizes = [4, 32], strides = [1, 1]} : vector<4x96xf32> to vector<4x32xf32>
      %194 = vector.extract_strided_slice %189 {offsets = [0, 64], sizes = [4, 32], strides = [1, 1]} : vector<4x96xf32> to vector<4x32xf32>
      %195 = arith.mulf %193, %169 : vector<4x32xf32>
      %196 = arith.mulf %192, %191 : vector<4x32xf32>
      %197 = arith.addf %195, %196 : vector<4x32xf32>
      %198 = math.tanh %197 : vector<4x32xf32>
      %199 = arith.mulf %194, %198 : vector<4x32xf32>
      %200 = arith.addi %0, %c3_i32 : i32
      %201 = vector.broadcast %200 : i32 to vector<4x32xi32>
      %202 = arith.cmpi sgt, %8, %201 : vector<4x32xi32>
      %203 = arith.select %202, %199, %168 : vector<4x32xi1>, vector<4x32xf32>
      %204 = arith.select %202, %197, %169 : vector<4x32xi1>, vector<4x32xf32>
      %205 = arith.truncf %203 : vector<4x32xf32> to vector<4x32xbf16>
      %206 = arith.index_cast %c3_i32 : i32 to index
      %c0_94 = arith.constant 0 : index
      %c0_95 = arith.constant 0 : index
      %207 = vector.load %arg10[%206, %c0_94, %c0_95] : memref<4x4x32xbf16, #tpu.memory_space<vmem>>, vector<1x4x32xbf16>
      %208 = vector.shape_cast %207 : vector<1x4x32xbf16> to vector<4x32xbf16>
      %209 = vector.shape_cast %205 : vector<4x32xbf16> to vector<1x4x32xbf16>
      tpu.vector_store %arg10[%206, %c0_94, %c0_95], %209 {strides = array<i32>} : memref<4x4x32xbf16, #tpu.memory_space<vmem>>, vector<1x4x32xbf16>,
      %c4_i32_96 = arith.constant 4 : i32
      %c0_97 = arith.constant 0 : index
      %c0_98 = arith.constant 0 : index
      %210 = vector.load %arg14[%c0_97, %c0_98] : memref<4x32xf32, #tpu.memory_space<vmem>>, vector<4x32xf32>
      tpu.vector_store %arg14[%c0_97, %c0_98], %203 {strides = array<i32>} : memref<4x32xf32, #tpu.memory_space<vmem>>, vector<4x32xf32>,
      %c0_99 = arith.constant 0 : index
      %c0_100 = arith.constant 0 : index
      %211 = vector.load %arg15[%c0_99, %c0_100] : memref<4x32xf32, #tpu.memory_space<vmem>>, vector<4x32xf32>
      tpu.vector_store %arg15[%c0_99, %c0_100], %204 {strides = array<i32>} : memref<4x32xf32, #tpu.memory_space<vmem>>, vector<4x32xf32>,
    } else {
    }
    %c2_i32 = arith.constant 2 : i32
    %21 = arith.cmpi eq, %arg1, %c2_i32 : i32
    %22 = arith.extui %21 : i1 to i32
    %c0_i32_8 = arith.constant 0 : i32
    %23 = arith.cmpi ne, %22, %c0_i32_8 : i32
    scf.if %23 {
      %c0_9 = arith.constant 0 : index
      %c0_10 = arith.constant 0 : index
      %24 = vector.load %arg14[%c0_9, %c0_10] : memref<4x32xf32, #tpu.memory_space<vmem>>, vector<4x32xf32>
      %c0_11 = arith.constant 0 : index
      %c0_12 = arith.constant 0 : index
      %25 = vector.load %arg11[%c0_11, %c0_12] : memref<4x32xf32, #tpu.memory_space<vmem>>, vector<4x32xf32>
      tpu.vector_store %arg11[%c0_11, %c0_12], %24 {strides = array<i32>} : memref<4x32xf32, #tpu.memory_space<vmem>>, vector<4x32xf32>,
      %c0_13 = arith.constant 0 : index
      %c0_14 = arith.constant 0 : index
      %26 = vector.load %arg15[%c0_13, %c0_14] : memref<4x32xf32, #tpu.memory_space<vmem>>, vector<4x32xf32>
      %c0_15 = arith.constant 0 : index
      %c0_16 = arith.constant 0 : index
      %27 = vector.load %arg12[%c0_15, %c0_16] : memref<4x32xf32, #tpu.memory_space<vmem>>, vector<4x32xf32>
      tpu.vector_store %arg12[%c0_15, %c0_16], %26 {strides = array<i32>} : memref<4x32xf32, #tpu.memory_space<vmem>>, vector<4x32xf32>,
    } else {
    }
    return
  }
  func.func @transform_0(%arg0: i32, %arg1: i32, %arg2: memref<2xi32, #tpu.memory_space<smem>>) -> (i32, i32) {
    %c0_i32 = arith.constant 0 : i32
    %c0_i32_0 = arith.constant 0 : i32
    return %arg0, %c0_i32 : i32, i32
  }
  func.func @transform_1(%arg0: i32, %arg1: i32, %arg2: memref<2xi32, #tpu.memory_space<smem>>) -> (i32, i32) {
    %c0_i32 = arith.constant 0 : i32
    %c0_i32_0 = arith.constant 0 : i32
    return %arg0, %c0_i32 : i32, i32
  }
  func.func @transform_2(%arg0: i32, %arg1: i32, %arg2: memref<2xi32, #tpu.memory_space<smem>>) -> (i32, i32) {
    %c0_i32 = arith.constant 0 : i32
    %c0_i32_0 = arith.constant 0 : i32
    return %arg0, %c0_i32 : i32, i32
  }
  func.func @transform_3(%arg0: i32, %arg1: i32, %arg2: memref<2xi32, #tpu.memory_space<smem>>) -> (i32, i32, i32) {
    %c0_i32 = arith.constant 0 : i32
    %c0_i32_0 = arith.constant 0 : i32
    return %arg1, %arg0, %c0_i32 : i32, i32, i32
  }
  func.func @transform_4(%arg0: i32, %arg1: i32, %arg2: memref<2xi32, #tpu.memory_space<smem>>) -> (i32, i32) {
    %c0_i32 = arith.constant 0 : i32
    %c0_i32_0 = arith.constant 0 : i32
    %c0_i32_1 = arith.constant 0 : i32
    return %c0_i32, %c0_i32_0 : i32, i32
  }
  func.func @transform_5(%arg0: i32, %arg1: i32, %arg2: memref<2xi32, #tpu.memory_space<smem>>) -> (i32, i32) {
    %c0_i32 = arith.constant 0 : i32
    %c0_i32_0 = arith.constant 0 : i32
    %c0_i32_1 = arith.constant 0 : i32
    return %c0_i32, %c0_i32_0 : i32, i32
  }
  func.func @transform_6(%arg0: i32, %arg1: i32, %arg2: memref<2xi32, #tpu.memory_space<smem>>) -> (i32, i32) {
    %c0_i32 = arith.constant 0 : i32
    %c0_i32_0 = arith.constant 0 : i32
    %c0_i32_1 = arith.constant 0 : i32
    return %c0_i32, %c0_i32_0 : i32, i32
  }
  func.func @transform_7(%arg0: i32, %arg1: i32, %arg2: memref<2xi32, #tpu.memory_space<smem>>) -> (i32, i32, i32) {
    %c0_i32 = arith.constant 0 : i32
    %c0_i32_0 = arith.constant 0 : i32
    return %arg1, %arg0, %c0_i32 : i32, i32, i32
  }
  func.func @transform_8(%arg0: i32, %arg1: i32, %arg2: memref<2xi32, #tpu.memory_space<smem>>) -> (i32, i32) {
    %c0_i32 = arith.constant 0 : i32
    %c0_i32_0 = arith.constant 0 : i32
    return %arg0, %c0_i32 : i32, i32
  }
  func.func @transform_9(%arg0: i32, %arg1: i32, %arg2: memref<2xi32, #tpu.memory_space<smem>>) -> (i32, i32) {
    %c0_i32 = arith.constant 0 : i32
    %c0_i32_0 = arith.constant 0 : i32
    return %arg0, %c0_i32 : i32, i32
  }
}

</mosaic_0001>

<bundles_post_ra>
// kernel: tpu_custom_call.1
= control target key start
LH: loop header
LB: loop body
LE: loop exit
PB: predicated region body
PF: predicated region fallthrough
CT: control target
= control target key end

     0   :  { %s3291_s0 = inlined_call_operand.vmem [shape: s32[2], index: 0, kind: input, shape index: {}]   ;;  %s3292_s1 = inlined_call_operand.vmem [shape: s32[4,1], index: 1, kind: input, shape index: {}]   ;;  %s3293_s2 = inlined_call_operand.vmem [shape: f32[4,32], index: 2, kind: input, shape index: {}]   ;;  %s3294_s3 = inlined_call_operand.hbm [shape: f32[4,32], index: 3, kind: input, shape index: {}]   ;;  %s3295_s4 = inlined_call_operand.hbm [shape: f32[12,4,16], index: 4, kind: input, shape index: {}]   ;;  %s3296_s5 = inlined_call_operand.vmem [shape: bf16[16,128], index: 5, kind: input, shape index: {}]   ;;  %s3297_s6 = inlined_call_operand.hbm [shape: bf16[32,128], index: 6, kind: input, shape index: {}]   ;;  %s3298_s7 = inlined_call_operand.vmem [shape: f32[1,128], index: 7, kind: input, shape index: {}]   ;;  %s3299_s8 = inlined_call_operand.hbm [shape: bf16[12,4,32], index: 8, kind: output, shape index: {0}]   ;;  %s3300_s9 = inlined_call_operand.hbm [shape: f32[4,32], index: 9, kind: output, shape index: {1}]   ;;  %s3301_s10 = inlined_call_operand.hbm [shape: f32[4,32], index: 10, kind: output, shape index: {2}]  }
   0x1   :  { %3314 = sst [smem:[#allocation27_spill]] %s3294_s3  ;;  %s16_s15 = sshll.u32 %s3291_s0, 4  ;;  %s17_s15 = int_to_ptr.vmem [resolvable:$true] %s16_s15 }
   0x2   :  { %3315 = sst [smem:[#allocation28_spill]] %s3297_s6  ;;  %s2487_s16 = scalar_lea.vmem %s17_s15, 16 }
   0x3   :  { %3316 = sst [smem:[#allocation29_spill]] %s3299_s8  ;;  %p2488_p0 = scmp.ne.s32.totalorder %s17_s15, %s2487_s16 }
   0x4   :  { %3317 = sst [smem:[#allocation30_spill]] %s3301_s10  ;;  %p2492_p1 = scmp.lt.s32.totalorder %s17_s15, %s17_s15 }
   0x5   :  { %p2493_p2 = scmp.lt.s32.totalorder %s2487_s16, %s2487_s16 }
   0x7   :  { %p2494_p3 = por %p2493_p2, %p2492_p1 }
   0x9   :  { %p2495_p4 = pnand %p2494_p3, %p2488_p0 }
   0xb   :  { %2498 = shalt.err (!%p2495_p4)  }
   0xc   :  { %s2723_s17 = smov [#allocation6]  }
   0xd   :  { %19 = dma.vmem_to_smem %s17_s15, 16, %s2723_s17, [#allocation5] }
   0xe   :  { %2677 = dma.done.wait [#allocation5], 16 }
   0xf   :  { %2678 = vsyncadd [#allocation5], 4294967280 }
  0x10   :  { %21 = sfence }
  0x11   :  { %22 = vsyncpa [#allocation8], 0 }
  0x12   :  { %23 = vsyncpa [#allocation11], 0 }
  0x13   :  { %25 = vsyncpa [#allocation11 + $0x1], 0 }
  0x14   :  { %26 = vsyncpa [#allocation9], 0 }
  0x15   :  { %28 = vsyncpa [#allocation9 + $0x1], 0 }
  0x16   :  { %29 = vsyncpa [#allocation15], 0  ;;  %s2805_s0 = smov 0   ;;  %s2807_s18 = smov 0  }
  0x17   :  { %s2809_s19 = smov 0   ;;  %s2811_s20 = smov 0  }
  0x18   :  { %s2813_s21 = smov 0   ;;  %s2815_s22 = smov 0  }
  0x19 LB: > { %3318 = sst [smem:[#allocation23_spill]] %s2701_s0  ;;  %s2836_s23 = sadd.s32 4294967295, %s2721_s22   ;;  %s2721_s22 = sphi %s2815_s22, %s35_s22   ;;  %s2717_s21 = sphi %s2813_s21, %s3358_s21   ;;  %s2713_s20 = sphi %s2811_s20, %s3357_s20   ;;  %s2709_s19 = sphi %s2809_s19, %s3356_s19   ;;  %s2705_s18 = sphi %s2807_s18, %s3355_s18   ;;  %s2701_s0 = sphi %s2805_s0, %s3354_s0  }
  0x1a   : > { %3319 = sst [smem:[#allocation24_spill]] %s2721_s22  ;;  %s2055_s24 = sadd.s32 4294967294, %s2721_s22  }
  0x1b   : > { %p141_p5 = scmp.ne.s32.totalorder %s2709_s19, %s2705_s18  ;;  %p142_p6 = scmp.eq.s32.totalorder %s2721_s22, 0 }
  0x1c   : > { %p147_p7 = scmp.ne.s32.totalorder %s2705_s18, %s2701_s0  ;;  %p3303_p8 = scmp.eq.s32.totalorder %s2836_s23, 0 }
  0x1d   : > { %p2845_p9 = por %p142_p6, %p141_p5  ;;  %p3302_p10 = scmp.eq.s32.totalorder %s2836_s23, 2 }
  0x1e   : > { %p2852_p11 = por %p3303_p8, %p147_p7  ;;  %p242_p12 = scmp.eq.s32.totalorder %s2055_s24, 2 }
  0x1f   : > { %p2858_p13 = por %p3302_p10, %p141_p5  ;;  %p2056_p0 = scmp.ge.s32.totalorder %s2721_s22, 1 }
  0x20   : > { %p2863_p1 = por %p242_p12, %p147_p7  ;;  %p301_p2 = scmp.lt.s32.totalorder %s2721_s22, 4 }
  0x21   : > { %s3322_s27 = scalar_select %p2858_p13, 1, 0 }
  0x22   : > { %s3324_s28 = scalar_select %p2863_p1, 1, 0 }
  0x23   : > { %3323 = sst [smem:[#allocation25_spill]] %s3322_s27  ;;  %p2868_p3 = pnand %p2056_p0, %p301_p2 }
  0x24   : > { %3325 = sst [smem:[#allocation26_spill]] %s3324_s28  ;;  %s2724_s30 = smov [#allocation12]  }
  0x25   : > { %s343_s11 = sshll.u32 %s2724_s30, 4  ;;  %p2319_p4 = pneg %p2868_p3  ;;  %s344_s11 = int_to_ptr.vmem [resolvable:$true] %s343_s11 }
  0x26   : > { %p2336_p5 = scmp.lt.s32.totalorder %s2721_s22, 3  ;;  %s2510_s14 = scalar_lea.vmem %s344_s11, 256 }
  0x27   : > { %p2877_p6 = pnand %p2319_p4, %p3303_p8  ;;  %p2511_p0 = scmp.ne.s32.totalorder %s344_s11, %s2510_s14 }
  0x28   : > { %p2883_p7 = pnand %p2336_p5, %p2845_p9  ;;  %p2518_p1 = scmp.lt.s32.totalorder %s344_s11, %s344_s11 }
  0x29   : > { %p2501_p12 = pneg %p2877_p6  ;;  %p2519_p4 = scmp.lt.s32.totalorder %s2510_s14, %s2510_s14 }
  0x2b   : > { %p2513_p2 = pnand %p2511_p0, %p2501_p12  ;;  %p2520_p8 = por %p2519_p4, %p2518_p1 }
  0x2d   : > { %p2514_p10 = pneg %p2513_p2 }
  0x2f   : > { %p2521_p13 = pnand %p2520_p8, %p2514_p10 }
  0x31   : > { %2524 = shalt.err (!%p2521_p13)
}
  0x32   : > { %s3307_s15 = smov 64   ;;  %s3308_s16 = smov 4  }
  0x33   : > { %s3329_s6 = sld [smem:[#allocation28_spill]]  ;;  %s2727_s25 = smov [#allocation7]  }
  0x34   : > { %s330_s30 = sshll.u32 %s2727_s25, 4  ;;  %s331_s30 = int_to_ptr.vmem [resolvable:$true] %s330_s30 }
  0x35   : > { %s2536_s28 = scalar_lea.vmem %s331_s30, 64  ;;  %p2544_p13 = scmp.lt.s32.totalorder %s331_s30, %s331_s30 }
  0x36   : > { %p2537_p9 = scmp.ne.s32.totalorder %s331_s30, %s2536_s28  ;;  %p2545_p1 = scmp.lt.s32.totalorder %s2536_s28, %s2536_s28 }
  0x38   : > { %p2539_p8 = pnand %p2537_p9, %p2501_p12  ;;  %p2546_p5 = por %p2545_p1, %p2544_p13 }
  0x39   : > { %2325 = dma.hbm_to_vmem [thread:$0]  (!%p2877_p6), %s3329_s6, 256, %s344_s11, [#allocation11], %s3307_s15, %s3307_s15, %s3308_s16  }
  0x3a   : > { %p2540_p10 = pneg %p2539_p8 }
  0x3c   : > { %p2547_p0 = pnand %p2546_p5, %p2540_p10 }
  0x3e   : > { %2550 = shalt.err (!%p2547_p0)
}
  0x3f   : > { %s3330_s3 = sld [smem:[#allocation27_spill]]  ;;  %s134_s11 = sadd.s32 1, %s2709_s19 }
  0x40   : > { %s44_s17 = sadd.s32 1, %s2717_s21  ;;  %s360_s28 = sand.u32 1, %s2721_s22  }
  0x41   : > { %p45_p12 = scmp.ge.s32.totalorder %s44_s17, 3  ;;  %s362_s24 = sand.u32 1, %s2709_s19  }
  0x42   : > { %s2145_s25 = sshll.u32 %s2717_s21, 8  ;;  %s2062_s12 = sshll.u32 %s362_s24, 4 }
  0x43   : > { %s3360_s17 = smov (%p45_p12, %s44_s17), 0  ;;  %s371_s15 = scalar_lea.hbm %s3295_s4, %s2145_s25 }
  0x44   : > { %s129_s16 = ssub.s32 %s2717_s21, %s3360_s17  ;;  %s364_s6 = scalar_lea.vmem [#allocation10], %s2062_s12 }
  0x45   : > { %2322 = dma.hbm_to_vmem [thread:$0]  (!%p2877_p6), %s3330_s3, 64, %s331_s30, [#allocation8]  }
  0x46   : > { %p132_p2 = scmp.eq.s32.totalorder %s129_s16, 0  ;;  %s372_s10 = sshll.u32 %s364_s6, 4  ;;  %s373_s10 = int_to_ptr.vmem [resolvable:$true] %s372_s10 }
  0x47   : > { %s361_s3 = scalar_lea.sflag [#allocation11], %s360_s28  ;;  %p2553_p6 = pneg %p2883_p7 }
  0x48   : > { %s2921_s30 = scalar_select %p132_p2, %s2709_s19, %s134_s11  }
  0x49   : > { %s2564_s22 = scalar_lea.vmem %s373_s10, 256  ;;  %s2728_s8 = smov [#allocation10]  }
  0x4a   : > { %p2565_p4 = scmp.ne.s32.totalorder %s373_s10, %s2564_s22  ;;  %s2569_s24 = sshll.u32 %s2728_s8, 4  ;;  %s2570_s24 = int_to_ptr.vmem [resolvable:$false] %s2569_s24 }
  0x4b   : > { %s2571_s27 = scalar_lea.vmem %s2570_s24, 512  ;;  %p2572_p10 = scmp.lt.s32.totalorder %s373_s10, %s2570_s24 }
  0x4c   : > { %p2567_p9 = pnand %p2565_p4, %p2553_p6  ;;  %p2573_p13 = scmp.lt.s32.totalorder %s2571_s27, %s2564_s22 }
  0x4e   : > { %p2568_p8 = pneg %p2567_p9  ;;  %p2574_p1 = por %p2573_p13, %p2572_p10 }
  0x50   : > { %p2575_p5 = pnand %p2574_p1, %p2568_p8 }
  0x52   : > { %2578 = shalt.err (!%p2575_p5)
}
  0x53   : > { %s3331_s6 = smov 4   ;;  %s3332_s16 = smov 64  }
  0x54   : > { %2329 = dma.hbm_to_vmem [thread:$0]  (!%p2883_p7), %s371_s15, 256, %s373_s10, %s361_s3, %s3332_s16, %s3332_s16, %s3331_s6  }
  0x55   : > { %384 = sbr.rel (%p2868_p3) target bundleno = 5912 (0x1718), region = 48  ;;  %p3333_p0 = scmp.eq.s32.totalorder (!%p2868_p3), %s2836_s23, 0 }
  0x5a   : > { %2680 = dma.done.wait (%p3333_p0), [#allocation8], 64   ;;  %p3334_p12 = pmov %p3333_p0 }
  0x5b   : > { %s390_s8 = sand.u32 1, %s2836_s23   ;;  %s2938_s22 = sand.u32 1, %s2705_s18  }
  0x5c   : > { %2682 = vsyncadd (%p3334_p12), [#allocation8], 4294967232  ;;  %s2067_s27 = sshll.u32 %s2938_s22, 4  ;;  %s391_s13 = scalar_lea.sflag [#allocation11], %s390_s8 }
  0x5d   : > { %s2941_s11 = scalar_lea.vmem [#allocation10], %s2067_s27 }
  0x5e   : > { %2684 = dma.done.wait (%p2852_p11), %s391_s13, 256  }
  0x5f   : > { %2686 = vsyncadd (%p2852_p11), %s391_s13, 4294967040  ;;  %p3335_p3 = pmov %p3333_p0 }
  0x60   : > { %p3336_p7 = pmov %p3333_p0 }
  0x61   : > { %2688 = dma.done.wait (%p3335_p3), [#allocation11], 256  }
  0x62   : > { %2690 = vsyncadd (%p3336_p7), [#allocation11], 4294967040  ;;  %s2069_s3 = sshll.u32 %s2938_s22, 3  ;;  %s2953_s10 = sshll.u32 %s2713_s20, 2 }
  0x63   : > { %s453_s29 = sld [smem:[#allocation6]]  ;;  %s2957_s28 = scalar_lea.vmem [#allocation13], %s2069_s3 }
  0x64   : > { %s2955_s15 = sld [smem:[#allocation6 + $0x1]]  ;;  %p2072_p2 = scmp.ne.s32.totalorder %s2713_s20, 0 }
  0x66   : > { %458 = sbr.rel (%p2072_p2) target bundleno = 109 (0x6d), region = 64 }
  0x6b   : > { %v459_v0 = vld [vmem:[%s3293_s2] sm:$0xf]  ;;  %vm460_vm0 = vcmask 257024   ;;  %v462_v1 = vld [vmem:[#allocation7] sm:$0xf] }
  0x6c   : > { %461 = vst.msk [vmem:[#allocation3] sm:$0xf] %vm460_vm0, %v459_v0  ;;  %463 = vst.msk [vmem:[#allocation4] sm:$0xf] %vm460_vm0, %v462_v1 }
  0x6d PF: > { %v464_v2 = vld [vmem:[%s3292_s1] sm:$0xf]  ;;  %s468_s14 = sadd.s32 4, %s2953_s10  ;;  %v2729_v3 = vmov 0   ;;  %p2073_p11 = scmp.lt.s32.totalorder %s2953_s10, %s2955_s15 }
  0x6e   : > { %2414 = vset.pattern.permute.xlu0 %v2729_v3 }
  0x6f   : > { %466 = vperm.xlu0 %2414, %v464_v2  }
  0xe6   : > { %473 = sbr.rel (%p2073_p11) target bundleno = 240 (0xf0), region = 68 }
  0xea   : > { %v2967_v4 = vpop.permute.xlu0 %466 }
  0xeb   : > { %v474_v5 = vld [vmem:[#allocation3] sm:$0xf]  ;;  %vm476_vm1 = vcmask 254976  }
  0xec   : > { %v475_v6 = vpack.c.bf16 %v474_v5, %v474_v5 }
  0xee   : > { %477 = vst.msk [vmem:[%s2957_s28] sm:$0x3] %vm476_vm1, %v475_v6  ;;  %478 = vst.msk [vmem:[%s2957_s28 + $0x2] sm:$0x3] %vm476_vm1, %v475_v6 }
  0xef   : > { %479 = vst.msk [vmem:[%s2957_s28 + $0x4] sm:$0x3] %vm476_vm1, %v475_v6  ;;  %480 = vst.msk [vmem:[%s2957_s28 + $0x6] sm:$0x3] %vm476_vm1, %v475_v6 }
  0xf0 PF: > { %p2978_p6 = scmp.gt.s32.totalorder %s468_s14, %s453_s29 }
  0xf1   : > { %s2732_s29 = smov (!%p2978_p6), 32   ;;  %s2733_s14 = smov (!%p2978_p6), 64  }
  0xf2   : > { %483 = sbr.rel (%p2978_p6) target bundleno = 3039 (0xbdf), region = 72  ;;  %s2735_s6 = smov (!%p2978_p6), 96  }
  0xf7   : > { %v2415_v7 = vld [vmem:[%s3296_s5] sm:$0xff]   ;;  %v2730_v8 = vmov 0.0   ;;  %v484_v9 = vld [vmem:[%s2941_s11] sm:$0xf]  ;;  %vm2731_vm2 = vmmov 0   ;;  %vm501_vm3 = vcmask 130048  }
  0xf8   : > { %2187 = vmatprep.subr.bf16.mxu0 %v2730_v8  ;;  %2193 = vmatprep.subr.bf16.mxu1 %v2730_v8  ;;  %v485_v10 = vpack.c.bf16 %v484_v9, %v484_v9  ;;  %v2416_v11 = vld [vmem:[%s3296_s5] sm:$0xff]   ;;  %v735_v16 = vld [vmem:[#allocation3] sm:$0xf]  ;;  %vm755_vm4 = vcmask 261120   ;;  %v736_v36 = vld [vmem:[#allocation4] sm:$0xf] }
  0xf9   : > { %2188 = vmatpush3.bf16.msra.mxu0 %v2415_v7  ;;  %2189 = vmatprep.mubr.msk.bf16.mxu0 %vm2731_vm2, %v2730_v8  ;;  %v2082_v12 = vld [vmem:[%s2941_s11 + $0x8] sm:$0xf]  ;;  %v2418_v15 = vld [vmem:[#allocation12] sm:$0xff]   ;;  %v738_v17 = vpack.c.bf16 %v735_v16, %v735_v16  ;;  %v2086_v51 = vld [vmem:[%s2941_s11 + $0xc] sm:$0xf]  ;;  %vm838_vm5 = vcmask 254976  }
  0xfa   : > { %2199 = vmatprep.subr.bf16.mxu0 %v2730_v8  ;;  %2195 = vmatprep.mubr.msk.bf16.mxu1 %vm2731_vm2, %v2730_v8  ;;  %v2417_v13 = vld [vmem:[#allocation12 + $0x8] sm:$0xff]   ;;  %v611_v14 = vpack.c.bf16 %v2082_v12, %v2082_v12  ;;  %v3014_v18 = vld [vmem:[%s3298_s7] ss:$0 sm:$0xff]  ;;  %v674_v53 = vpack.c.bf16 %v2086_v51, %v2086_v51  ;;  %vm1141_vm6 = vcmask 257024  }
  0xfb   : > { %v2419_v47 = vld [vmem:[%s3296_s5] sm:$0xff]  }
  0xfc   : > { %2190 = vmatmul.mubr.msk.bf16.vlgmr.msra.gmra.mxu0 %vm501_vm3, %v485_v10  ;;  %v2078_v48 = vld [vmem:[%s2941_s11 + $0x4] sm:$0xf]  ;;  %2194 = vmatpush3.bf16.msra.mxu1 %v2419_v47  ;;  %v2421_v54 = vld [vmem:[#allocation12 + $0x8] sm:$0xff]  }
  0xfd   : > { %2200 = vmatpush3.bf16.msra.mxu0 %v2416_v11  ;;  %2201 = vmatprep.mubr.msk.bf16.mxu0 %vm2731_vm2, %v2730_v8  ;;  %v548_v49 = vpack.c.bf16 %v2078_v48, %v2078_v48  ;;  %v2420_v50 = vld [vmem:[%s3296_s5] sm:$0xff]  }
  0xfe   : > { %2211 = vmatprep.subr.bf16.mxu0 %v2730_v8  ;;  %2205 = vmatprep.subr.bf16.mxu1 %v2730_v8  ;;  %v2422_v55 = vld [vmem:[#allocation12] sm:$0xff]   ;;  %v2425_v47 = vld [vmem:[#allocation12 + $0x8] sm:$0xff]  }
  0xff   : > { %2196 = vmatmul.mubr.msk.bf16.vlgmr.msra.gmra.mxu1 %vm501_vm3, %v548_v49  ;;  %v2426_v48 = vld [vmem:[#allocation12] sm:$0xff]  }
 0x100   : > { %2206 = vmatpush3.bf16.msra.mxu1 %v2420_v50  ;;  %2207 = vmatprep.mubr.msk.bf16.mxu1 %vm2731_vm2, %v2730_v8 }
 0x101   : > { %2219 = vmatprep.subr.bf16.mxu1 %v2730_v8 }
 0x104   : > { %2202 = vmatmul.mubr.msk.bf16.vlgmr.msra.gmra.mxu0 %vm501_vm3, %v611_v14 }
 0x105   : > { %2212 = vmatpush3.bf16.msra.mxu0 %v2417_v13  ;;  %2215 = vmatprep.mubr.msk.bf16.mxu0 %vm2731_vm2, %v2730_v8 }
 0x106   : > { %2213 = vmatprep.subr.bf16.mxu0 %v2730_v8 }
 0x107   : > { %2208 = vmatmul.mubr.msk.bf16.vlgmr.msra.gmra.mxu1 %vm501_vm3, %v674_v53 }
 0x108   : > { %2220 = vmatpush3.bf16.msra.mxu1 %v2421_v54  ;;  %2223 = vmatprep.mubr.msk.bf16.mxu1 %vm2731_vm2, %v2730_v8 }
 0x109   : > { %2214 = vmatpush3.bf16.msra.mxu0 %v2418_v15  ;;  %2221 = vmatprep.subr.bf16.mxu1 %v2730_v8 }
 0x10a   : > { %2227 = vmatprep.subr.bf16.mxu0 %v2730_v8 }
 0x10c   : > { %2216 = vmatmul.mubr.msk.bf16.vlgmr.msra.gmra.mxu0 %vm755_vm4, %v738_v17  ;;  %2222 = vmatpush3.bf16.msra.mxu1 %v2422_v55 }
 0x10d   : > { %2231 = vmatprep.mubr.msk.bf16.mxu0 %vm2731_vm2, %v2730_v8  ;;  %2235 = vmatprep.subr.bf16.mxu1 %v2730_v8 }
 0x1bc   : > { %v539_v19 = vpop.f32.mrf.mxu0 }
 0x1bd   : > { %v540_v20 = vadd.f32 %v3014_v18, %v539_v19 }
 0x1be   : > { %v2191_v21 = vpop.f32.mrf.mxu0 }
 0x1bf   : > { %545 = vst [vmem:[#allocation2] sm:$0xf] %v540_v20  ;;  %v601_v59 = vpop.f32.mrf.mxu1 }
 0x1c0   : > { %v542_v22 = vpop.f32.mrf.mxu0  ;;  %v602_v60 = vadd.f32 %v3014_v18, %v601_v59 }
 0x1c1   : > { %v2197_v61 = vpop.f32.mrf.mxu1 }
 0x1c2   : > { %v2192_v23 = vpop.f32.mrf.mxu0  ;;  %608 = vst [vmem:[#allocation2 + $0x4] sm:$0xf] %v602_v60 }
 0x1c3   : > { %v604_v62 = vpop.f32.mrf.mxu1 }
 0x1c4   : > { %v664_v24 = vpop.f32.mrf.mxu0 }
 0x1c5   : > { %v665_v25 = vadd.f32 %v3014_v18, %v664_v24  ;;  %v2198_v63 = vpop.f32.mrf.mxu1  ;;  %v2423_v24 = vld [vmem:[#allocation12 + $0x8] sm:$0xff]  }
 0x1c6   : > { %v2203_v26 = vpop.f32.mrf.mxu0  ;;  %v737_v29 = vld [vmem:[#allocation2] sm:$0xf]  ;;  %2228 = vmatpush3.bf16.msra.mxu0 %v2423_v24  ;;  %v2734_v63 = vmov 1983009808  }
 0x1c7   : > { %671 = vst [vmem:[#allocation2 + $0x8] sm:$0xf] %v665_v25  ;;  %v727_v0 = vpop.f32.mrf.mxu1  ;;  %v2424_v25 = vld [vmem:[#allocation12] sm:$0xff]   ;;  %2229 = vmatprep.subr.bf16.mxu0 %v2730_v8 }
 0x1c8   : > { %v667_v27 = vpop.f32.mrf.mxu0  ;;  %v728_v1 = vadd.f32 %v3014_v18, %v727_v0  ;;  %v829_v0 = vunpack.c.l.s4 %v2734_v63 }
 0x1c9   : > { %v2209_v2 = vpop.f32.mrf.mxu1  ;;  %v840_v7 = vld [vmem:[#allocation2 + $0x4] sm:$0xf] }
 0x1ca   : > { %v2204_v28 = vpop.f32.mrf.mxu0  ;;  %734 = vst [vmem:[#allocation2 + $0xc] sm:$0xf] %v728_v1  ;;  %2230 = vmatpush3.bf16.msra.mxu0 %v2424_v25  ;;  %v831_v1 = vlaneseq }
 0x1cb   : > { %v730_v3 = vpop.f32.mrf.mxu1 }
 0x1cc   : > { %v793_v30 = vpop.f32.mrf.mxu0  ;;  %v830_v3 = vunpack.c.0.s8 %v829_v0 }
 0x1cd   : > { %v799_v31 = vadd.f32 %v793_v30, %v737_v29  ;;  %v2210_v5 = vpop.f32.mrf.mxu1 }
 0x1ce   : > { %v2217_v32 = vpop.f32.mrf.mxu0  ;;  %v832_v5 = vshrl.u32 %v831_v1, 7 }
 0x1cf   : > { %2427 = vtanh.f32 %v799_v31  ;;  %v800_v37 = vmul.f32 0.5, %v799_v31  ;;  %v939_v31 = vld [vmem:[#allocation2 + $0x8] sm:$0xf] }
 0x1d0   : > { %v796_v33 = vpop.f32.mrf.mxu0 }
 0x1d1   : > { %2429 = vtanh.f32 %v800_v37  ;;  %v1038_v54 = vld [vmem:[#allocation2 + $0xc] sm:$0xf] }
 0x1d2   : > { %v2218_v34 = vpop.f32.mrf.mxu0 }
 0x1dc   : > { %v2428_v35 = vpop.eup %2427 }
 0x1dd   : > { %811 = vrot.lane.b32.xlu0 %v2428_v35, %s2732_s29 }
 0x1de   : > { %v2430_v38 = vpop.eup %2429 }
 0x1df   : > { %v802_v39 = vmul.f32 0.5, %v2430_v38 }
 0x1e1   : > { %806 = vrot.lane.b32.xlu0 %v736_v36, %s2732_s29  ;;  %v803_v40 = vadd.f32 0.5, %v802_v39 }
 0x24f   : > { %v812_v41 = vpop.permute.xlu0 %811 }
 0x250   : > { %v814_v42 = vmul.f32 %v812_v41, %v803_v40 }
 0x252   : > { %816 = vrot.lane.b32.xlu1 %v814_v42, %s2732_s29 }
 0x253   : > { %v807_v43 = vpop.permute.xlu0 %806 }
 0x254   : > { %v809_v44 = vmul.f32 %v807_v43, %v803_v40 }
 0x2c4   : > { %v817_v45 = vpop.permute.xlu1 %816 }
 0x2c5   : > { %v819_v46 = vadd.f32 %v817_v45, %v809_v44 }
 0x2c7   : > { %2431 = vtanh.f32 %v819_v46 }
 0x2d4   : > { %v2432_v52 = vpop.eup %2431 }
 0x2d5   : > { %822 = vrot.lane.b32.xlu1 %v2432_v52, %s2732_s29 }
 0x347   : > { %v823_v56 = vpop.permute.xlu1 %822 }
 0x348   : > { %v825_v57 = vmul.f32 %v823_v56, %v803_v40 }
 0x34a   : > { %v3040_v58 = vpack.c.bf16 %v825_v57, %v825_v57 }
 0x34c   : > { %845 = vrot.lane.b32.xlu0 %v3040_v58, %s2733_s14 }
 0x3be   : > { %v846_v6 = vpop.permute.xlu0 %845 }
 0x3bf   : > { %2224 = vmatmul.mubr.msk.bf16.vlgmr.msra.gmra.mxu1 %vm755_vm4, %v846_v6 }
 0x3c0   : > { %2239 = vmatprep.mubr.msk.bf16.mxu1 %vm2731_vm2, %v2730_v8  ;;  %2236 = vmatpush3.bf16.msra.mxu1 %v2425_v47 }
 0x3c1   : > { %2237 = vmatprep.subr.bf16.mxu1 %v2730_v8 }
 0x3c4   : > { %2238 = vmatpush3.bf16.msra.mxu1 %v2426_v48 }
 0x47f   : > { %v896_v9 = vpop.f32.mrf.mxu1 }
 0x480   : > { %v902_v10 = vadd.f32 %v896_v9, %v840_v7  ;;  %v833_v9 = vsub.s32 %v830_v3, %v832_v5 }
 0x481   : > { %v2225_v11 = vpop.f32.mrf.mxu1 }
 0x482   : > { %2433 = vtanh.f32 %v902_v10  ;;  %v903_v15 = vmul.f32 0.5, %v902_v10  ;;  %v834_v11 = vrot.slane %v3040_v58, %v833_v9 }
 0x483   : > { %v899_v12 = vpop.f32.mrf.mxu1 }
 0x484   : > { %2435 = vtanh.f32 %v903_v15 }
 0x485   : > { %v2226_v13 = vpop.f32.mrf.mxu1 }
 0x48f   : > { %v2434_v14 = vpop.eup %2433 }
 0x490   : > { %910 = vrot.lane.b32.xlu1 %v2434_v14, %s2732_s29 }
 0x491   : > { %v2436_v16 = vpop.eup %2435 }
 0x492   : > { %v905_v17 = vmul.f32 0.5, %v2436_v16 }
 0x494   : > { %v906_v18 = vadd.f32 0.5, %v905_v17 }
 0x496   : > { %v908_v21 = vmul.f32 %v906_v18, %v819_v46 }
 0x502   : > { %v911_v19 = vpop.permute.xlu1 %910 }
 0x503   : > { %v913_v20 = vmul.f32 %v911_v19, %v906_v18 }
 0x505   : > { %915 = vrot.lane.b32.xlu0 %v913_v20, %s2732_s29 }
 0x577   : > { %v916_v22 = vpop.permute.xlu0 %915 }
 0x578   : > { %v918_v23 = vadd.f32 %v916_v22, %v908_v21 }
 0x57a   : > { %2437 = vtanh.f32 %v918_v23 }
 0x587   : > { %v2438_v26 = vpop.eup %2437 }
 0x588   : > { %921 = vrot.lane.b32.xlu1 %v2438_v26, %s2732_s29 }
 0x5fa   : > { %v922_v27 = vpop.permute.xlu1 %921 }
 0x5fb   : > { %v924_v28 = vmul.f32 %v922_v27, %v906_v18 }
 0x5fd   : > { %v3053_v29 = vpack.c.bf16 %v924_v28, %v924_v28 }
 0x5ff   : > { %944 = vrot.lane.b32.xlu0 %v3053_v29, %s2733_s14  ;;  %v933_v58 = vrot.slane %v3053_v29, %v833_v9 }
 0x671   : > { %v945_v30 = vpop.permute.xlu0 %944 }
 0x672   : > { %2232 = vmatmul.mubr.msk.bf16.vlgmr.msra.gmra.mxu0 %vm755_vm4, %v945_v30 }
 0x732   : > { %v995_v32 = vpop.f32.mrf.mxu0 }
 0x733   : > { %v1001_v33 = vadd.f32 %v995_v32, %v939_v31 }
 0x734   : > { %v2233_v34 = vpop.f32.mrf.mxu0 }
 0x735   : > { %2439 = vtanh.f32 %v1001_v33  ;;  %v1002_v38 = vmul.f32 0.5, %v1001_v33 }
 0x736   : > { %v998_v35 = vpop.f32.mrf.mxu0 }
 0x737   : > { %2441 = vtanh.f32 %v1002_v38 }
 0x738   : > { %v2234_v36 = vpop.f32.mrf.mxu0 }
 0x742   : > { %v2440_v37 = vpop.eup %2439 }
 0x743   : > { %1009 = vrot.lane.b32.xlu1 %v2440_v37, %s2732_s29 }
 0x744   : > { %v2442_v39 = vpop.eup %2441 }
 0x745   : > { %v1004_v40 = vmul.f32 0.5, %v2442_v39 }
 0x747   : > { %v1005_v41 = vadd.f32 0.5, %v1004_v40 }
 0x749   : > { %v1007_v44 = vmul.f32 %v1005_v41, %v918_v23 }
 0x7b5   : > { %v1010_v42 = vpop.permute.xlu1 %1009 }
 0x7b6   : > { %v1012_v43 = vmul.f32 %v1010_v42, %v1005_v41 }
 0x7b8   : > { %1014 = vrot.lane.b32.xlu0 %v1012_v43, %s2732_s29 }
 0x82a   : > { %v1015_v45 = vpop.permute.xlu0 %1014 }
 0x82b   : > { %v1017_v46 = vadd.f32 %v1015_v45, %v1007_v44 }
 0x82d   : > { %2443 = vtanh.f32 %v1017_v46 }
 0x83a   : > { %v2444_v49 = vpop.eup %2443 }
 0x83b   : > { %1020 = vrot.lane.b32.xlu1 %v2444_v49, %s2732_s29 }
 0x8ad   : > { %v1021_v50 = vpop.permute.xlu1 %1020 }
 0x8ae   : > { %v1023_v51 = vmul.f32 %v1021_v50, %v1005_v41 }
 0x8b0   : > { %v1024_v52 = vpack.c.bf16 %v1023_v51, %v1023_v51 }
 0x8b2   : > { %1043 = vrot.lane.b32.xlu0 %v1024_v52, %s2733_s14  ;;  %v1032_v12 = vrot.slane %v1024_v52, %v833_v9 }
 0x924   : > { %v1044_v53 = vpop.permute.xlu0 %1043 }
 0x925   : > { %2240 = vmatmul.mubr.msk.bf16.vlgmr.msra.gmra.mxu1 %vm755_vm4, %v1044_v53 }
 0x9e5   : > { %v1094_v55 = vpop.f32.mrf.mxu1 }
 0x9e6   : > { %v1100_v56 = vadd.f32 %v1094_v55, %v1038_v54 }
 0x9e7   : > { %v2241_v57 = vpop.f32.mrf.mxu1 }
 0x9e8   : > { %2445 = vtanh.f32 %v1100_v56  ;;  %v1101_v61 = vmul.f32 0.5, %v1100_v56 }
 0x9e9   : > { %v1097_v59 = vpop.f32.mrf.mxu1 }
 0x9ea   : > { %2447 = vtanh.f32 %v1101_v61 }
 0x9eb   : > { %v2242_v60 = vpop.f32.mrf.mxu1 }
 0x9f5   : > { %v2446_v8 = vpop.eup %2445 }
 0x9f6   : > { %1108 = vrot.lane.b32.xlu1 %v2446_v8, %s2732_s29 }
 0x9f7   : > { %v2448_v62 = vpop.eup %2447 }
 0x9f8   : > { %v1103_v2 = vmul.f32 0.5, %v2448_v62 }
 0x9fa   : > { %v1104_v6 = vadd.f32 0.5, %v1103_v2 }
 0x9fc   : > { %v1106_v13 = vmul.f32 %v1104_v6, %v1017_v46 }
 0xa68   : > { %v1109_v7 = vpop.permute.xlu1 %1108 }
 0xa69   : > { %v1111_v10 = vmul.f32 %v1109_v7, %v1104_v6 }
 0xa6b   : > { %1113 = vrot.lane.b32.xlu0 %v1111_v10, %s2732_s29 }
 0xa6f   : > { %835 = vrot.lane.b32.xlu0 %v834_v11, %s2733_s14 }
 0xa73   : > { %1033 = vrot.lane.b32.xlu0 %v1032_v12, %s2733_s14 }
 0xadd   : > { %v1114_v14 = vpop.permute.xlu0 %1113 }
 0xade   : > { %v1116_v15 = vadd.f32 %v1114_v14, %v1106_v13 }
 0xae0   : > { %2449 = vtanh.f32 %v1116_v15 }
 0xae1   : > { %v836_v16 = vpop.permute.xlu0 %835 }
 0xae2   : > { %839 = vst.msk [vmem:[%s2957_s28] sm:$0x3] %vm838_vm5, %v836_v16 }
 0xae5   : > { %v1034_v17 = vpop.permute.xlu0 %1033 }
 0xae6   : > { %2100 = vst.msk [vmem:[%s2957_s28 + $0x4] sm:$0x3] %vm838_vm5, %v1034_v17 }
 0xaed   : > { %v2450_v18 = vpop.eup %2449 }
 0xaee   : > { %1119 = vrot.lane.b32.xlu1 %v2450_v18, %s2732_s29 }
 0xaf2   : > { %934 = vrot.lane.b32.xlu1 %v933_v58, %s2733_s14 }
 0xb60   : > { %v1120_v19 = vpop.permute.xlu1 %1119 }
 0xb61   : > { %v1122_v20 = vmul.f32 %v1120_v19, %v1104_v6 }
 0xb63   : > { %v1123_v21 = vpack.c.bf16 %v1122_v20, %v1122_v20  ;;  %1138 = vrot.lane.b32.xlu0 %v1122_v20, %s2733_s14 }
 0xb64   : > { %v935_v22 = vpop.permute.xlu1 %934 }
 0xb65   : > { %2096 = vst.msk [vmem:[%s2957_s28 + $0x2] sm:$0x3] %vm838_vm5, %v935_v22  ;;  %v1131_v23 = vrot.slane %v1123_v21, %v833_v9 }
 0xb67   : > { %1132 = vrot.lane.b32.xlu1 %v1131_v23, %s2733_s14 }
 0xb6b   : > { %1144 = vrot.lane.b32.xlu1 %v1116_v15, %s2735_s6 }
 0xbd5   : > { %v1139_v24 = vpop.permute.xlu0 %1138 }
 0xbd6   : > { %1142 = vst.msk [vmem:[#allocation3] sm:$0xf] %vm1141_vm6, %v1139_v24 }
 0xbd9   : > { %v1133_v25 = vpop.permute.xlu1 %1132 }
 0xbda   : > { %2104 = vst.msk [vmem:[%s2957_s28 + $0x6] sm:$0x3] %vm838_vm5, %v1133_v25 }
 0xbdd   : > { %v1145_v26 = vpop.permute.xlu1 %1144 }
 0xbde   : > { %1147 = vst.msk [vmem:[#allocation4] sm:$0xf] %vm1141_vm6, %v1145_v26 }
 0xbdf PF: > { %p1150_p4 = pnand %p2978_p6, %p2073_p11 }
 0xbe0   : > { %s2738_s3 = smov (!%p1150_p4), 32   ;;  %s2739_s29 = smov (!%p1150_p4), 64  }
 0xbe1   : > { %1153 = sbr.rel (%p1150_p4) target bundleno = 5842 (0x16d2), region = 76  ;;  %s1707_s14 = sadd.s32 (!%p1150_p4), 2, %s2953_s10 }
 0xbe2   : > { %s1811_s6 = sadd.s32 (!%p1150_p4), 3, %s2953_s10  ;;  %s2741_s16 = smov (!%p1150_p4), 96  }
 0xbe6   : > { %v2451_v27 = vld [vmem:[%s3296_s5] sm:$0xff]   ;;  %v2736_v28 = vmov 0.0   ;;  %v1154_v29 = vld [vmem:[%s2941_s11] sm:$0xf]  ;;  %vm2737_vm7 = vmmov 0   ;;  %vm1171_vm8 = vcmask 130048   ;;  %v1496_v14 = vstv %s2953_s10 }
 0xbe7   : > { %2243 = vmatprep.subr.bf16.mxu0 %v2736_v28  ;;  %2249 = vmatprep.subr.bf16.mxu1 %v2736_v28  ;;  %v1155_v30 = vpack.c.bf16 %v1154_v29, %v1154_v29  ;;  %v2452_v31 = vld [vmem:[%s3296_s5] sm:$0xff]   ;;  %v1405_v36 = vld [vmem:[#allocation3] sm:$0xf]  ;;  %vm1425_vm9 = vcmask 261120   ;;  %v1406_v56 = vld [vmem:[#allocation4] sm:$0xf]  ;;  %vm3152_vm10 = vcmp.gt.s32.totalorder %v2967_v4, %v1496_v14 }
 0xbe8   : > { %2244 = vmatpush3.bf16.msra.mxu0 %v2451_v27  ;;  %2245 = vmatprep.mubr.msk.bf16.mxu0 %vm2737_vm7, %v2736_v28  ;;  %v2112_v32 = vld [vmem:[%s2941_s11 + $0x8] sm:$0xf]  ;;  %v2454_v35 = vld [vmem:[#allocation12] sm:$0xff]   ;;  %v1408_v37 = vpack.c.bf16 %v1405_v36, %v1405_v36  ;;  %v2116_v9 = vld [vmem:[%s2941_s11 + $0xc] sm:$0xf]  ;;  %vm1516_vm13 = vcmask 254976  }
 0xbe9   : > { %2255 = vmatprep.subr.bf16.mxu0 %v2736_v28  ;;  %2251 = vmatprep.mubr.msk.bf16.mxu1 %vm2737_vm7, %v2736_v28  ;;  %v2453_v33 = vld [vmem:[#allocation12 + $0x8] sm:$0xff]   ;;  %v1281_v34 = vpack.c.bf16 %v2112_v32, %v2112_v32  ;;  %v3117_v38 = vld [vmem:[%s3298_s7] ss:$0 sm:$0xff]  ;;  %v1344_v11 = vpack.c.bf16 %v2116_v9, %v2116_v9  ;;  %vm1834_vm15 = vcmask 257024  }
 0xbea   : > { %v2455_v3 = vld [vmem:[%s3296_s5] sm:$0xff]  }
 0xbeb   : > { %2246 = vmatmul.mubr.msk.bf16.vlgmr.msra.gmra.mxu0 %vm1171_vm8, %v1155_v30  ;;  %v2108_v5 = vld [vmem:[%s2941_s11 + $0x4] sm:$0xf]  ;;  %2250 = vmatpush3.bf16.msra.mxu1 %v2455_v3  ;;  %v2457_v12 = vld [vmem:[#allocation12 + $0x8] sm:$0xff]   ;;  %s1603_s11 = sadd.s32 1, %s2953_s10 }
 0xbec   : > { %2256 = vmatpush3.bf16.msra.mxu0 %v2452_v31  ;;  %2257 = vmatprep.mubr.msk.bf16.mxu0 %vm2737_vm7, %v2736_v28  ;;  %v1218_v6 = vpack.c.bf16 %v2108_v5, %v2108_v5  ;;  %v2456_v7 = vld [vmem:[%s3296_s5] sm:$0xff]  }
 0xbed   : > { %2267 = vmatprep.subr.bf16.mxu0 %v2736_v28  ;;  %2261 = vmatprep.subr.bf16.mxu1 %v2736_v28  ;;  %v2458_v13 = vld [vmem:[#allocation12] sm:$0xff]  }
 0xbee   : > { %2252 = vmatmul.mubr.msk.bf16.vlgmr.msra.gmra.mxu1 %vm1171_vm8, %v1218_v6  ;;  %v2462_v14 = vld [vmem:[#allocation12] sm:$0xff]  }
 0xbef   : > { %2262 = vmatpush3.bf16.msra.mxu1 %v2456_v7  ;;  %2263 = vmatprep.mubr.msk.bf16.mxu1 %vm2737_vm7, %v2736_v28 }
 0xbf0   : > { %2275 = vmatprep.subr.bf16.mxu1 %v2736_v28 }
 0xbf3   : > { %2258 = vmatmul.mubr.msk.bf16.vlgmr.msra.gmra.mxu0 %vm1171_vm8, %v1281_v34 }
 0xbf4   : > { %2268 = vmatpush3.bf16.msra.mxu0 %v2453_v33  ;;  %2271 = vmatprep.mubr.msk.bf16.mxu0 %vm2737_vm7, %v2736_v28 }
 0xbf5   : > { %2269 = vmatprep.subr.bf16.mxu0 %v2736_v28 }
 0xbf6   : > { %2264 = vmatmul.mubr.msk.bf16.vlgmr.msra.gmra.mxu1 %vm1171_vm8, %v1344_v11 }
 0xbf7   : > { %2276 = vmatpush3.bf16.msra.mxu1 %v2457_v12  ;;  %2279 = vmatprep.mubr.msk.bf16.mxu1 %vm2737_vm7, %v2736_v28 }
 0xbf8   : > { %2270 = vmatpush3.bf16.msra.mxu0 %v2454_v35  ;;  %2277 = vmatprep.subr.bf16.mxu1 %v2736_v28 }
 0xbf9   : > { %2283 = vmatprep.subr.bf16.mxu0 %v2736_v28 }
 0xbfb   : > { %2272 = vmatmul.mubr.msk.bf16.vlgmr.msra.gmra.mxu0 %vm1425_vm9, %v1408_v37  ;;  %2278 = vmatpush3.bf16.msra.mxu1 %v2458_v13  ;;  %v2461_v13 = vld [vmem:[#allocation12 + $0x8] sm:$0xff]  }
 0xbfc   : > { %2287 = vmatprep.mubr.msk.bf16.mxu0 %vm2737_vm7, %v2736_v28  ;;  %2291 = vmatprep.subr.bf16.mxu1 %v2736_v28 }
 0xcab   : > { %v1209_v39 = vpop.f32.mrf.mxu0 }
 0xcac   : > { %v1210_v40 = vadd.f32 %v3117_v38, %v1209_v39 }
 0xcad   : > { %v2247_v41 = vpop.f32.mrf.mxu0 }
 0xcae   : > { %1215 = vst [vmem:[#allocation2] sm:$0xf] %v1210_v40  ;;  %v1271_v20 = vpop.f32.mrf.mxu1 }
 0xcaf   : > { %v1212_v42 = vpop.f32.mrf.mxu0  ;;  %v1272_v21 = vadd.f32 %v3117_v38, %v1271_v20 }
 0xcb0   : > { %v2253_v22 = vpop.f32.mrf.mxu1 }
 0xcb1   : > { %v2248_v43 = vpop.f32.mrf.mxu0  ;;  %1278 = vst [vmem:[#allocation2 + $0x4] sm:$0xf] %v1272_v21 }
 0xcb2   : > { %v1274_v23 = vpop.f32.mrf.mxu1 }
 0xcb3   : > { %v1334_v44 = vpop.f32.mrf.mxu0 }
 0xcb4   : > { %v1335_v45 = vadd.f32 %v3117_v38, %v1334_v44  ;;  %v2254_v24 = vpop.f32.mrf.mxu1 }
 0xcb5   : > { %v2259_v46 = vpop.f32.mrf.mxu0  ;;  %v1407_v49 = vld [vmem:[#allocation2] sm:$0xf] }
 0xcb6   : > { %1341 = vst [vmem:[#allocation2 + $0x8] sm:$0xf] %v1335_v45  ;;  %v1397_v25 = vpop.f32.mrf.mxu1 }
 0xcb7   : > { %v1337_v47 = vpop.f32.mrf.mxu0  ;;  %v1398_v26 = vadd.f32 %v3117_v38, %v1397_v25 }
 0xcb8   : > { %v2265_v27 = vpop.f32.mrf.mxu1  ;;  %v1518_v32 = vld [vmem:[#allocation2 + $0x4] sm:$0xf] }
 0xcb9   : > { %v2260_v48 = vpop.f32.mrf.mxu0  ;;  %1404 = vst [vmem:[#allocation2 + $0xc] sm:$0xf] %v1398_v26 }
 0xcba   : > { %v1400_v29 = vpop.f32.mrf.mxu1 }
 0xcbb   : > { %v1463_v50 = vpop.f32.mrf.mxu0 }
 0xcbc   : > { %v1469_v51 = vadd.f32 %v1463_v50, %v1407_v49  ;;  %v2266_v30 = vpop.f32.mrf.mxu1  ;;  %v2459_v49 = vld [vmem:[#allocation12 + $0x8] sm:$0xff]   ;;  %v2460_v50 = vld [vmem:[#allocation12] sm:$0xff]  }
 0xcbd   : > { %v2273_v52 = vpop.f32.mrf.mxu0  ;;  %2284 = vmatpush3.bf16.msra.mxu0 %v2459_v49 }
 0xcbe   : > { %2463 = vtanh.f32 %v1469_v51  ;;  %v1470_v57 = vmul.f32 0.5, %v1469_v51  ;;  %2285 = vmatprep.subr.bf16.mxu0 %v2736_v28  ;;  %v1604_v52 = vstv %s1603_s11 }
 0xcbf   : > { %v1466_v53 = vpop.f32.mrf.mxu0  ;;  %vm1605_vm11 = vcmp.gt.s32.totalorder %v2967_v4, %v1604_v52 }
 0xcc0   : > { %2465 = vtanh.f32 %v1470_v57 }
 0xcc1   : > { %v2274_v54 = vpop.f32.mrf.mxu0  ;;  %2286 = vmatpush3.bf16.msra.mxu0 %v2460_v50  ;;  %v1812_v50 = vstv %s1811_s6 }
 0xcc2   : > { %vm1813_vm14 = vcmp.gt.s32.totalorder %v2967_v4, %v1812_v50 }
 0xccb   : > { %v2464_v55 = vpop.eup %2463 }
 0xccc   : > { %1481 = vrot.lane.b32.xlu0 %v2464_v55, %s2738_s3 }
 0xccd   : > { %v2466_v59 = vpop.eup %2465 }
 0xcce   : > { %v1472_v60 = vmul.f32 0.5, %v2466_v59  ;;  %v1622_v59 = vld [vmem:[#allocation2 + $0x8] sm:$0xf] }
 0xcd0   : > { %1476 = vrot.lane.b32.xlu0 %v1406_v56, %s2738_s3  ;;  %v1473_v8 = vadd.f32 0.5, %v1472_v60 }
 0xcd4   : > { %1499 = vrot.lane.b32.xlu0 %v1405_v36, %s2739_s29 }
 0xd3e   : > { %v1482_v61 = vpop.permute.xlu0 %1481 }
 0xd3f   : > { %v1484_v62 = vmul.f32 %v1482_v61, %v1473_v8 }
 0xd41   : > { %1486 = vrot.lane.b32.xlu1 %v1484_v62, %s2738_s3 }
 0xd42   : > { %v3125_v63 = vpop.permute.xlu0 %1476 }
 0xd43   : > { %v1479_v0 = vmul.f32 %v3125_v63, %v1473_v8 }
 0xd46   : > { %v1500_v16 = vpop.permute.xlu0 %1499 }
 0xdb3   : > { %v1487_v1 = vpop.permute.xlu1 %1486 }
 0xdb4   : > { %v3128_v2 = vadd.f32 %v1487_v1, %v1479_v0 }
 0xdb6   : > { %2467 = vtanh.f32 %v3128_v2  ;;  %v1503_v45 = vsel %vm3152_vm10, %v3128_v2, %v3125_v63 }
 0xdc3   : > { %v2468_v10 = vpop.eup %2467 }
 0xdc4   : > { %1492 = vrot.lane.b32.xlu1 %v2468_v10, %s2738_s3 }
 0xe36   : > { %v1493_v15 = vpop.permute.xlu1 %1492 }
 0xe37   : > { %v1495_v17 = vmul.f32 %v1493_v15, %v1473_v8 }
 0xe39   : > { %v1502_v58 = vsel %vm3152_vm10, %v1495_v17, %v1500_v16  ;;  %v1708_v16 = vstv %s1707_s14 }
 0xe3a   : > { %v3158_v19 = vpack.c.bf16 %v1502_v58, %v1502_v58  ;;  %vm1709_vm12 = vcmp.gt.s32.totalorder %v2967_v4, %v1708_v16 }
 0xe3c   : > { %1523 = vrot.lane.b32.xlu1 %v3158_v19, %s2739_s29 }
 0xeae   : > { %v1524_v31 = vpop.permute.xlu1 %1523 }
 0xeaf   : > { %2280 = vmatmul.mubr.msk.bf16.vlgmr.msra.gmra.mxu1 %vm1425_vm9, %v1524_v31  ;;  %v2740_v31 = vmov 1983009808  }
 0xeb0   : > { %2295 = vmatprep.mubr.msk.bf16.mxu1 %vm2737_vm7, %v2736_v28  ;;  %2292 = vmatpush3.bf16.msra.mxu1 %v2461_v13 }
 0xeb1   : > { %2293 = vmatprep.subr.bf16.mxu1 %v2736_v28  ;;  %v1726_v28 = vld [vmem:[#allocation2 + $0xc] sm:$0xf] }
 0xeb4   : > { %2294 = vmatpush3.bf16.msra.mxu1 %v2462_v14 }
 0xf6f   : > { %v1574_v33 = vpop.f32.mrf.mxu1 }
 0xf70   : > { %v1580_v34 = vadd.f32 %v1574_v33, %v1518_v32  ;;  %v1507_v32 = vunpack.c.l.s4 %v2740_v31  ;;  %v1509_v33 = vlaneseq }
 0xf71   : > { %v2281_v35 = vpop.f32.mrf.mxu1 }
 0xf72   : > { %2469 = vtanh.f32 %v1580_v34  ;;  %v1581_v38 = vmul.f32 0.5, %v1580_v34  ;;  %v1508_v35 = vunpack.c.0.s8 %v1507_v32 }
 0xf73   : > { %v1577_v36 = vpop.f32.mrf.mxu1 }
 0xf74   : > { %2471 = vtanh.f32 %v1581_v38  ;;  %v1510_v36 = vshrl.u32 %v1509_v33, 7 }
 0xf75   : > { %v2282_v37 = vpop.f32.mrf.mxu1 }
 0xf7f   : > { %v2470_v39 = vpop.eup %2469 }
 0xf80   : > { %1588 = vrot.lane.b32.xlu0 %v2470_v39, %s2738_s3 }
 0xf81   : > { %v2472_v40 = vpop.eup %2471 }
 0xf82   : > { %v1583_v41 = vmul.f32 0.5, %v2472_v40  ;;  %v1511_v40 = vsub.s32 %v1508_v35, %v1510_v36 }
 0xf84   : > { %v1584_v42 = vadd.f32 0.5, %v1583_v41  ;;  %v1512_v41 = vrot.slane %v3158_v19, %v1511_v40 }
 0xf86   : > { %v1586_v46 = vmul.f32 %v1584_v42, %v1503_v45 }
 0xff2   : > { %v1589_v43 = vpop.permute.xlu0 %1588 }
 0xff3   : > { %v1591_v44 = vmul.f32 %v1589_v43, %v1584_v42 }
 0xff5   : > { %1593 = vrot.lane.b32.xlu1 %v1591_v44, %s2738_s3 }
0x1067   : > { %v1594_v47 = vpop.permute.xlu1 %1593 }
0x1068   : > { %v1596_v48 = vadd.f32 %v1594_v47, %v1586_v46 }
0x106a   : > { %2473 = vtanh.f32 %v1596_v48  ;;  %v1607_v9 = vsel %vm1605_vm11, %v1596_v48, %v1503_v45 }
0x1077   : > { %v2474_v51 = vpop.eup %2473 }
0x1078   : > { %1599 = vrot.lane.b32.xlu0 %v2474_v51, %s2738_s3 }
0x10ea   : > { %v1600_v53 = vpop.permute.xlu0 %1599 }
0x10eb   : > { %v1602_v54 = vmul.f32 %v1600_v53, %v1584_v42 }
0x10ed   : > { %v1606_v55 = vsel %vm1605_vm11, %v1602_v54, %v1502_v58 }
0x10ee   : > { %v3179_v56 = vpack.c.bf16 %v1606_v55, %v1606_v55 }
0x10f0   : > { %1627 = vrot.lane.b32.xlu1 %v3179_v56, %s2739_s29  ;;  %v1616_v49 = vrot.slane %v3179_v56, %v1511_v40 }
0x1162   : > { %v1628_v57 = vpop.permute.xlu1 %1627 }
0x1163   : > { %2288 = vmatmul.mubr.msk.bf16.vlgmr.msra.gmra.mxu0 %vm1425_vm9, %v1628_v57 }
0x1223   : > { %v1678_v60 = vpop.f32.mrf.mxu0 }
0x1224   : > { %v1684_v8 = vadd.f32 %v1678_v60, %v1622_v59 }
0x1225   : > { %v2289_v61 = vpop.f32.mrf.mxu0 }
0x1226   : > { %2475 = vtanh.f32 %v1684_v8  ;;  %v1685_v1 = vmul.f32 0.5, %v1684_v8 }
0x1227   : > { %v1681_v62 = vpop.f32.mrf.mxu0 }
0x1228   : > { %2477 = vtanh.f32 %v1685_v1 }
0x1229   : > { %v2290_v63 = vpop.f32.mrf.mxu0 }
0x1233   : > { %v2476_v0 = vpop.eup %2475 }
0x1234   : > { %1692 = vrot.lane.b32.xlu0 %v2476_v0, %s2738_s3 }
0x1235   : > { %v2478_v2 = vpop.eup %2477 }
0x1236   : > { %v1687_v3 = vmul.f32 0.5, %v2478_v2 }
0x1238   : > { %v1688_v5 = vadd.f32 0.5, %v1687_v3 }
0x123a   : > { %v1690_v10 = vmul.f32 %v1688_v5, %v1607_v9 }
0x12a6   : > { %v1693_v6 = vpop.permute.xlu0 %1692 }
0x12a7   : > { %v1695_v7 = vmul.f32 %v1693_v6, %v1688_v5 }
0x12a9   : > { %1697 = vrot.lane.b32.xlu1 %v1695_v7, %s2738_s3 }
0x131b   : > { %v1698_v11 = vpop.permute.xlu1 %1697 }
0x131c   : > { %v1700_v12 = vadd.f32 %v1698_v11, %v1690_v10 }
0x131e   : > { %2479 = vtanh.f32 %v1700_v12  ;;  %v1711_v43 = vsel %vm1709_vm12, %v1700_v12, %v1607_v9 }
0x132b   : > { %v2480_v15 = vpop.eup %2479 }
0x132c   : > { %1703 = vrot.lane.b32.xlu0 %v2480_v15, %s2738_s3 }
0x139e   : > { %v1704_v17 = vpop.permute.xlu0 %1703 }
0x139f   : > { %v1706_v18 = vmul.f32 %v1704_v17, %v1688_v5 }
0x13a1   : > { %v1710_v58 = vsel %vm1709_vm12, %v1706_v18, %v1606_v55 }
0x13a2   : > { %v1712_v20 = vpack.c.bf16 %v1710_v58, %v1710_v58 }
0x13a4   : > { %1731 = vrot.lane.b32.xlu1 %v1712_v20, %s2739_s29  ;;  %v1720_v42 = vrot.slane %v1712_v20, %v1511_v40 }
0x1416   : > { %v1732_v21 = vpop.permute.xlu1 %1731 }
0x1417   : > { %2296 = vmatmul.mubr.msk.bf16.vlgmr.msra.gmra.mxu1 %vm1425_vm9, %v1732_v21 }
0x14d7   : > { %v1782_v22 = vpop.f32.mrf.mxu1 }
0x14d8   : > { %v1788_v23 = vadd.f32 %v1782_v22, %v1726_v28 }
0x14d9   : > { %v2297_v24 = vpop.f32.mrf.mxu1 }
0x14da   : > { %2481 = vtanh.f32 %v1788_v23  ;;  %v1789_v29 = vmul.f32 0.5, %v1788_v23 }
0x14db   : > { %v1785_v25 = vpop.f32.mrf.mxu1 }
0x14dc   : > { %2483 = vtanh.f32 %v1789_v29 }
0x14dd   : > { %v2298_v26 = vpop.f32.mrf.mxu1 }
0x14e7   : > { %v2482_v27 = vpop.eup %2481 }
0x14e8   : > { %1796 = vrot.lane.b32.xlu0 %v2482_v27, %s2738_s3 }
0x14e9   : > { %v2484_v30 = vpop.eup %2483 }
0x14ea   : > { %v1791_v34 = vmul.f32 0.5, %v2484_v30 }
0x14ec   : > { %v1792_v37 = vadd.f32 0.5, %v1791_v34 }
0x14ee   : > { %v1794_v44 = vmul.f32 %v1792_v37, %v1711_v43 }
0x155a   : > { %v1797_v39 = vpop.permute.xlu0 %1796 }
0x155b   : > { %v1799_v38 = vmul.f32 %v1797_v39, %v1792_v37 }
0x155d   : > { %1801 = vrot.lane.b32.xlu1 %v1799_v38, %s2738_s3 }
0x1561   : > { %1513 = vrot.lane.b32.xlu1 %v1512_v41, %s2739_s29 }
0x1565   : > { %1721 = vrot.lane.b32.xlu1 %v1720_v42, %s2739_s29 }
0x15cf   : > { %v1802_v45 = vpop.permute.xlu1 %1801 }
0x15d0   : > { %v1804_v46 = vadd.f32 %v1802_v45, %v1794_v44 }
0x15d2   : > { %2485 = vtanh.f32 %v1804_v46  ;;  %v1815_v56 = vsel %vm1813_vm14, %v1804_v46, %v1711_v43 }
0x15d3   : > { %v1514_v47 = vpop.permute.xlu1 %1513 }
0x15d4   : > { %1517 = vst.msk [vmem:[%s2957_s28] sm:$0x3] %vm1516_vm13, %v1514_v47 }
0x15d7   : > { %v1722_v48 = vpop.permute.xlu1 %1721 }
0x15d8   : > { %2130 = vst.msk [vmem:[%s2957_s28 + $0x4] sm:$0x3] %vm1516_vm13, %v1722_v48 }
0x15df   : > { %v2486_v19 = vpop.eup %2485 }
0x15e0   : > { %1807 = vrot.lane.b32.xlu0 %v2486_v19, %s2738_s3 }
0x15e4   : > { %1617 = vrot.lane.b32.xlu0 %v1616_v49, %s2739_s29 }
0x1652   : > { %v1808_v51 = vpop.permute.xlu0 %1807 }
0x1653   : > { %v1810_v52 = vmul.f32 %v1808_v51, %v1792_v37 }
0x1655   : > { %v1814_v53 = vsel %vm1813_vm14, %v1810_v52, %v1710_v58 }
0x1656   : > { %v1618_v54 = vpop.permute.xlu0 %1617  ;;  %v1816_v55 = vpack.c.bf16 %v1814_v53, %v1814_v53  ;;  %1831 = vrot.lane.b32.xlu1 %v1814_v53, %s2739_s29 }
0x1657   : > { %2126 = vst.msk [vmem:[%s2957_s28 + $0x2] sm:$0x3] %vm1516_vm13, %v1618_v54 }
0x1658   : > { %v1824_v57 = vrot.slane %v1816_v55, %v1511_v40 }
0x165a   : > { %1825 = vrot.lane.b32.xlu0 %v1824_v57, %s2739_s29 }
0x165e   : > { %1837 = vrot.lane.b32.xlu0 %v1815_v56, %s2741_s16 }
0x16c8   : > { %v1832_v59 = vpop.permute.xlu1 %1831 }
0x16c9   : > { %1835 = vst.msk [vmem:[#allocation3] sm:$0xf] %vm1834_vm15, %v1832_v59 }
0x16cc   : > { %v1826_v60 = vpop.permute.xlu0 %1825 }
0x16cd   : > { %2134 = vst.msk [vmem:[%s2957_s28 + $0x6] sm:$0x3] %vm1516_vm13, %v1826_v60 }
0x16d0   : > { %v1838_v4 = vpop.permute.xlu0 %1837 }
0x16d1   : > { %1840 = vst.msk [vmem:[#allocation4] sm:$0xf] %vm1834_vm15, %v1838_v4 }
0x16d2 PF: > { %p2135_p9 = scmp.ne.s32.totalorder %s2713_s20, 2 }
0x16d4   : > { %1844 = sbr.rel (%p2135_p9) target bundleno = 5851 (0x16db), region = 80 }
0x16d9   : > { %v1845_v8 = vld [vmem:[#allocation3] sm:$0xf]  ;;  %vm1846_vm0 = vcmask 257024   ;;  %v1848_v61 = vld [vmem:[#allocation4] sm:$0xf] }
0x16da   : > { %1847 = vst.msk [vmem:[#allocation14] sm:$0xf] %vm1846_vm0, %v1845_v8  ;;  %1849 = vst.msk [vmem:[#allocation16] sm:$0xf] %vm1846_vm0, %v1848_v61 }
0x16db PF: > { %s2742_s10 = smov [#allocation14]   ;;  %s2146_s15 = sshll.u32 %s2713_s20, 7 }
0x16dc   : > { %s1881_s8 = sshll.u32 %s2742_s10, 4  ;;  %p3340_p10 = scmp.eq.s32.totalorder %s2836_s23, 2  ;;  %s1882_s8 = int_to_ptr.vmem [resolvable:$true] %s1881_s8 }
0x16dd   : > { %s2579_s24 = scalar_lea.vmem %s1882_s8, 64  ;;  %p2586_p5 = scmp.lt.s32.totalorder %s1882_s8, %s1882_s8 }
0x16de   : > { %p2580_p8 = scmp.ne.s32.totalorder %s1882_s8, %s2579_s24  ;;  %p2587_p0 = scmp.lt.s32.totalorder %s2579_s24, %s2579_s24 }
0x16e0   : > { %p2581_p13 = pnand %p2580_p8, %p3340_p10  ;;  %p2588_p12 = por %p2587_p0, %p2586_p5 }
0x16e2   : > { %p2582_p1 = pneg %p2581_p13 }
0x16e4   : > { %p2589_p3 = pnand %p2588_p12, %p2582_p1 }
0x16e6   : > { %2592 = shalt.err (!%p2589_p3)
}
0x16e7   : > { %p3341_p7 = pmov %p3340_p10  ;;  %s3342_s3 = sld [smem:[#allocation25_spill]] }
0x16e8   : > { %s3343_s26 = sld [smem:[#allocation29_spill]]  ;;  %s1865_s12 = sshll.u32 %s2957_s28, 4  ;;  %s3233_s12 = int_to_ptr.vmem [resolvable:$true] %s1865_s12 }
0x16e9   : > { %2311 = dma.vmem_to_hbm [thread:$0]  (%p3341_p7), %s1882_s8, 64, %s3300_s9, [#allocation15]  }
0x16ea   : > { %s1851_s0 = scalar_lea.sflag [#allocation9], %s2938_s22  ;;  %s2603_s11 = scalar_lea.vmem %s3233_s12, 128 }
0x16eb   : > { %p2604_p2 = scmp.ne.s32.totalorder %s3233_s12, %s2603_s11  ;;  %s2743_s14 = smov [#allocation13]  }
0x16ec   : > { %s2607_s6 = sshll.u32 %s2743_s14, 4  ;;  %s2608_s6 = int_to_ptr.vmem [resolvable:$false] %s2607_s6 }
0x16ed   : > { %p3344_p11 = scmp.ne.s32.totalorder %s3342_s3, 0  ;;  %s2609_s16 = scalar_lea.vmem %s2608_s6, 256 }
0x16ee   : > { %s3230_s25 = scalar_lea.hbm %s3343_s26, %s2146_s15  ;;  %p2610_p9 = scmp.lt.s32.totalorder %s3233_s12, %s2608_s6 }
0x16ef   : > { %p2605_p6 = pnand %p2604_p2, %p3344_p11  ;;  %p2611_p8 = scmp.lt.s32.totalorder %s2609_s16, %s2603_s11 }
0x16f1   : > { %p2606_p4 = pneg %p2605_p6  ;;  %p2612_p10 = por %p2611_p8, %p2610_p9 }
0x16f3   : > { %p2613_p13 = pnand %p2612_p10, %p2606_p4 }
0x16f5   : > { %2616 = shalt.err (!%p2613_p13)
}
0x16f6   : > { %s2617_s28 = scalar_lea.hbm %s3230_s25, 128  ;;  %s2621_s15 = scalar_lea.hbm %s3343_s26, 384 }
0x16f7   : > { %p2618_p1 = scmp.ne.s32.totalorder %s3230_s25, %s2617_s28  ;;  %p2622_p12 = scmp.lt.s32.totalorder %s3230_s25, %s3343_s26 }
0x16f8   : > { %p2623_p3 = scmp.lt.s32.totalorder %s2621_s15, %s2617_s28 }
0x16f9   : > { %p2619_p5 = pnand %p2618_p1, %p3344_p11 }
0x16fa   : > { %p2624_p7 = por %p2623_p3, %p2622_p12 }
0x16fb   : > { %p2620_p0 = pneg %p2619_p5 }
0x16fd   : > { %p2625_p2 = pnand %p2624_p7, %p2620_p0 }
0x16ff   : > { %2628 = shalt.err (!%p2625_p2)
}
0x1700   : > { %s2744_s13 = smov 32   ;;  %s2745_s20 = smov 2  }
0x1701   : > { %2309 = dma.vmem_to_hbm [thread:$0]  (%p3344_p11), %s3233_s12, 128, %s3230_s25, %s1851_s0, %s2744_s13, %s2744_s13, %s2745_s20  }
0x1702   : > { %s2746_s29 = smov [#allocation16]   ;;  %p3345_p4 = scmp.eq.s32.totalorder %s2836_s23, 2 }
0x1703   : > { %s1894_s11 = sshll.u32 %s2746_s29, 4  ;;  %s1895_s11 = int_to_ptr.vmem [resolvable:$true] %s1894_s11 }
0x1704   : > { %s2629_s14 = scalar_lea.vmem %s1895_s11, 64  ;;  %p2636_p10 = scmp.lt.s32.totalorder %s1895_s11, %s1895_s11 }
0x1705   : > { %p2630_p6 = scmp.ne.s32.totalorder %s1895_s11, %s2629_s14  ;;  %p2637_p13 = scmp.lt.s32.totalorder %s2629_s14, %s2629_s14 }
0x1707   : > { %p2631_p9 = pnand %p2630_p6, %p3345_p4  ;;  %p2638_p1 = por %p2637_p13, %p2636_p10 }
0x1709   : > { %p2632_p8 = pneg %p2631_p9 }
0x170b   : > { %p2639_p5 = pnand %p2638_p1, %p2632_p8 }
0x170d   : > { %2642 = shalt.err (!%p2639_p5)
}
0x170e   : > { %p3346_p0 = pmov %p3345_p4  ;;  %s3347_s3 = sld [smem:[#allocation30_spill]] }
0x1710   : > { %p3348_p11 = pmov %p3346_p0 }
0x1714   : > { %2313 = dma.vmem_to_hbm [thread:$0]  (%p3346_p0), %s1895_s11, 64, %s3347_s3, [#allocation15]  }
0x1715   : > { %2692 = dma.done.wait (%p3348_p11), [#allocation15], 128   ;;  %p3349_p12 = pmov %p3346_p0 }
0x1717   : > { %2694 = vsyncadd (%p3349_p12), [#allocation15], 4294967168 }
0x1718 PF: > { %s3350_s22 = sld [smem:[#allocation24_spill]] }
0x1719   : > { %s3351_s25 = sld [smem:[#allocation23_spill]] }
0x171a   : > { %s3352_s12 = sld [smem:[#allocation26_spill]] }
0x171e   : > { %p2343_p3 = scmp.ge.s32.totalorder %s3350_s22, 2 }
0x171f   : > { %s1914_s0 = sand.u32 1, %s3351_s25  }
0x1720   : > { %p3353_p7 = scmp.ne.s32.totalorder %s3352_s12, 0  ;;  %s1915_s28 = scalar_lea.sflag [#allocation9], %s1914_s0 }
0x1722   : > { %p2331_p2 = pnand %p2343_p3, %p3353_p7 }
0x1724   : > { %p2332_p6 = pneg %p2331_p2 }
0x1726   : > { %2696 = dma.done.wait (%p2332_p6), %s1915_s28, 128  }
0x1727   : > { %2698 = vsyncadd (%p2332_p6), %s1915_s28, 4294967168  ;;  %s35_s22 = sadd.s32 1, %s3350_s22   ;;  %s3354_s0 = smov %s2705_s18 }
0x1728   : > { %p32_p4 = scmp.ge.s32.totalorder %s35_s22, 5   ;;  %s3355_s18 = smov %s2709_s19 }
0x1729   : > { %s3356_s19 = smov %s2921_s30  ;;  %s3357_s20 = smov %s2717_s21 }
0x172a   : > { %s3358_s21 = smov %s3360_s17  ;;  %34 = sbr.rel (!%p32_p4) target bundleno = 25 (0x19), region = 165 }
0x172f   :  { %1920 = vsyncpa [#allocation8], 1 }
0x1730   :  { %1922 = vsyncpa [#allocation8 + $0x1], 1 }
0x1731   :  { %1923 = vsyncpa [#allocation11], 1 }
0x1732   :  { %1925 = vsyncpa [#allocation11 + $0x1], 1 }
0x1733   :  { %1926 = vsyncpa [#allocation9], 1 }
0x1734   :  { %1928 = vsyncpa [#allocation9 + $0x1], 1 }
0x1735   :  { %1929 = vsyncpa [#allocation15], 1 }

</bundles_post_ra>
